<compile_context>
chip_gen: v7x
topology: tpu7x:2x2x1
jax: 0.10.0
libtpu: 0.0.40
codegen_flags: <defaults>
</compile_context>

<pallas_src>
import functools
import math

import jax
import jax.numpy as jnp
from jax.experimental import pallas as pl
from jax.experimental.pallas import tpu as pltpu


_MAX_WIDE_LANES = 8192  # cap on the widened last dim (lanes)


# --------------------------------------------------------------------------
# Kernel
# --------------------------------------------------------------------------
def _selective_dropout_kernel(x_ref, mask_ref, o_ref):
    # x_ref:    (block_b, W) tile of activations
    # mask_ref: (1, W)       per-feature mask row (resident; constant index map)
    # Implicit sublane broadcast; cheap filler under the HBM-bound multiply.
    o_ref[...] = x_ref[...] * mask_ref[...]


@functools.partial(jax.jit, static_argnames=("block_b", "vmem_limit"))
def _apply_mask_pallas(x, mask_row, *, block_b, vmem_limit):
    B, W = x.shape
    itemsize = x.dtype.itemsize
    grid = (pl.cdiv(B, block_b),)
    return pl.pallas_call(
        _selective_dropout_kernel,
        out_shape=jax.ShapeDtypeStruct((B, W), x.dtype),
        grid_spec=pltpu.PrefetchScalarGridSpec(
            num_scalar_prefetch=0,
            grid=grid,
            in_specs=[
                pl.BlockSpec((block_b, W), lambda i: (i, 0)),
                # constant index map -> mask fetched once, resident thereafter
                pl.BlockSpec((1, W), lambda i: (0, 0)),
            ],
            out_specs=pl.BlockSpec((block_b, W), lambda i: (i, 0)),
        ),
        compiler_params=pltpu.CompilerParams(
            dimension_semantics=("parallel",),
            vmem_limit_bytes=vmem_limit,
        ),
        cost_estimate=pl.CostEstimate(
            flops=B * W,
            transcendentals=0,
            bytes_accessed=2 * B * W * itemsize + W * itemsize,
        ),
    )(x, mask_row)


# --------------------------------------------------------------------------
# Generation-aware planning
# --------------------------------------------------------------------------
def _tpu_budget():
    """Per-generation tiling budget.  Conservative defaults if query fails."""
    vmem_phys = 128 << 20
    try:
        info = pltpu.get_tpu_info()
        vmem_phys = int(getattr(info, "vmem_capacity_bytes", vmem_phys))
    except Exception:
        # Unknown hardware (or CPU interpret) -> assume the tighter v7x budget.
        vmem_phys = 64 << 20
    if vmem_phys <= (64 << 20):
        # v7x-class: 64 MiB VMEM/TC, 2 TensorCores/chip, ~3.2 TB/s HBM.
        return {
            "target_tile": 4 << 20,
            "vmem_cap": 48 << 20,
            "two_cores": True,
            "min_pallas_bytes": 1 << 20,
        }
    # v5e/v6e-class: 128 MiB VMEM, 1 TensorCore/chip.
    return {
        "target_tile": 8 << 20,
        "vmem_cap": 96 << 20,
        "two_cores": False,
        "min_pallas_bytes": 256 << 10,
    }


def _plan_layout(B, F, itemsize, *, target_tile, vmem_cap, two_cores):
    """Pick (k, block_b, vmem_limit).

    k:       lane-widening factor ([B, F] -> [B/k, k*F]) so the last dim is a
             multiple of 128 where possible.
    block_b: batch tile; a multiple-of-8 divisor of B/k (no partial last tile),
             with an even step count preferred on 2-TC chips.
    """
    # ---- lane widening: largest k dividing B with (k*F) % 128 == 0, k*F <= cap
    need = 128 // math.gcd(F, 128)         # k must be a multiple of this
    k = 1 if F % 128 == 0 else 0
    kk = need
    while kk * F <= _MAX_WIDE_LANES:
        if B % kk == 0:
            k = kk
        kk += need
    if k == 0:
        k = 1  # can't reach a 128-multiple width; keep original layout (masked stores)
    Bw, W = B // k, k * F

    # ---- batch tile rows: aim for target_tile bytes, multiple of 8
    row_bytes = W * itemsize
    rows = max(8, (target_tile // row_bytes) // 8 * 8)
    rows = min(rows, Bw)

    def pick(require_even_steps):
        d = (rows // 8) * 8
        while d >= 8:
            if Bw % d == 0 and (not require_even_steps or (Bw // d) % 2 == 0):
                return d
            d -= 8
        return None

    block_b = None
    if two_cores:
        # Even number of equal tiles so both TensorCores get the same work.
        block_b = pick(require_even_steps=True)
    if block_b is None:
        block_b = pick(require_even_steps=False)
    if block_b is None:
        # No multiple-of-8 divisor of Bw: use the full extent if it fits
        # (single resident tile), else accept a masked partial trailing tile.
        block_b = Bw if Bw <= rows else rows

    # ---- VMEM budget from the actual footprint (2-deep pipeline, in + out)
    tile_bytes = block_b * W * itemsize
    mask_bytes = W * itemsize
    vmem_limit = min(vmem_cap,
                     max(32 << 20, 4 * tile_bytes + 2 * mask_bytes + (4 << 20)))
    return k, block_b, int(vmem_limit)


# --------------------------------------------------------------------------
# Public wrapper (forward pass of the PyTorch module)
# --------------------------------------------------------------------------
def selective_dropout(inputs, *, dropout_rate, neuron_indices, training, key):
    """Forward pass matching the PyTorch SelectiveDropout module.

    inputs:         [B, F] (or higher rank with shape[-1] == shape[1])
    dropout_rate:   python float
    neuron_indices: python list/tuple of ints in [0, F)
    training:       python bool
    key:            jax PRNG key (used only on the training path)
    """
    if (not training) or (len(neuron_indices) == 0) or (dropout_rate == 0):
        return inputs

    if inputs.ndim < 2:
        raise ValueError("SelectiveDropout needs rank >= 2 inputs "
                         "(the mask length is inputs.shape[1]).")
    F = inputs.shape[1]
    # The PyTorch module builds a length-shape[1] mask and broadcasts it
    # against the LAST axis; for rank > 2 that requires shape[-1] == shape[1].
    if inputs.ndim != 2 and inputs.shape[-1] != F:
        raise ValueError(
            "per-feature mask (len = inputs.shape[1]) broadcasts against the "
            "last axis; need inputs.shape[-1] == inputs.shape[1]")

    # p >= 1: the scale branch is never taken in the reference (uniform < 1
    # always), so every selected neuron is dropped; avoid the 1/(1-p) div-by-0.
    scale = 0.0 if dropout_rate >= 1.0 else 1.0 / (1.0 - dropout_rate)

    neuron_indices = [int(i) for i in neuron_indices]
    rand = jax.random.uniform(key, (len(neuron_indices),), dtype=jnp.float32)
    vals = jnp.where(rand < dropout_rate, jnp.float32(0.0), jnp.float32(scale))
    # Duplicate indices: the PyTorch loop lets the LAST occurrence's draw win.
    last_pos = {}
    for pos, i in enumerate(neuron_indices):
        last_pos[i] = pos
    uniq_idx = jnp.asarray(list(last_pos.keys()), dtype=jnp.int32)
    uniq_pos = jnp.asarray(list(last_pos.values()), dtype=jnp.int32)
    neuron_mask = (
        jnp.ones((F,), dtype=jnp.float32).at[uniq_idx].set(vals[uniq_pos])
    ).astype(inputs.dtype)  # dtype-matched mask: bf16 stays bf16 (no promotion)

    budget = _tpu_budget()

    # Tiny tensors: plain JAX multiply (XLA fuses); kernel launch would dominate.
    if inputs.size * inputs.dtype.itemsize < budget["min_pallas_bytes"]:
        return inputs * neuron_mask

    # Flatten leading dims, widen lanes, run the kernel, reshape back.
    x2d = inputs.reshape(-1, inputs.shape[-1])
    B = x2d.shape[0]
    k, block_b, vmem_limit = _plan_layout(
        B, F, inputs.dtype.itemsize,
        target_tile=budget["target_tile"],
        vmem_cap=budget["vmem_cap"],
        two_cores=budget["two_cores"],
    )
    x_wide = x2d.reshape(B // k, k * F)
    mask_wide = jnp.tile(neuron_mask, k).reshape(1, k * F)
    out_wide = _apply_mask_pallas(
        x_wide, mask_wide, block_b=block_b, vmem_limit=vmem_limit)
    return out_wide.reshape(inputs.shape)


# --------------------------------------------------------------------------
# Self-test
# --------------------------------------------------------------------------
if __name__ == "__main__":
    key = jax.random.PRNGKey(0)
    k_x, k_drop, k_xs, k_xo = jax.random.split(key, 4)

    dropout_rate = 0.5
    neuron_indices = [1, 3, 7, 12, 33, 64, 100, 127]
    F = 128

    # --- reference mask (same draws as the wrapper; indices are distinct) ---
    idx = jnp.asarray(neuron_indices, dtype=jnp.int32)
    rand = jax.random.uniform(k_drop, (len(neuron_indices),), dtype=jnp.float32)
    vals = jnp.where(rand < dropout_rate, 0.0, 1.0 / (1.0 - dropout_rate))
    ref_mask = jnp.ones((F,), jnp.float32).at[idx].set(vals)

    # --- Case 1: large enough for the Pallas path on every generation ---
    B = 4096                                               # 2 MiB f32
    x = jax.random.normal(k_x, (B, F), dtype=jnp.float32)
    out = selective_dropout(
        x, dropout_rate=dropout_rate, neuron_indices=neuron_indices,
        training=True, key=k_drop)
    out = jax.block_until_ready(out)
    ref = x * ref_mask[None, :]
    assert out.shape == x.shape and out.dtype == x.dtype
    assert jnp.allclose(out, ref, atol=1e-6), "Pallas path mismatch vs reference"

    # --- Case 2: odd geometry (F not a multiple of 128) stays correct ---
    Fo, Bo = 96, 768
    xo = jax.random.normal(k_xo, (Bo, Fo), dtype=jnp.float32)
    ido = jnp.asarray([0, 5, 50, 95], dtype=jnp.int32)
    rando = jax.random.uniform(k_drop, (4,), dtype=jnp.float32)
    valso = jnp.where(rando < dropout_rate, 0.0, 1.0 / (1.0 - dropout_rate))
    ref_mask_o = jnp.ones((Fo,), jnp.float32).at[ido].set(valso)
    out_o = jax.block_until_ready(selective_dropout(
        xo, dropout_rate=dropout_rate, neuron_indices=[0, 5, 50, 95],
        training=True, key=k_drop))
    assert jnp.allclose(out_o, xo * ref_mask_o[None, :], atol=1e-6)

    # --- Case 3: tiny input -> plain-JAX fallback path ---
    xs = jax.random.normal(k_xs, (8, F), dtype=jnp.float32)
    out_s = jax.block_until_ready(selective_dropout(
        xs, dropout_rate=dropout_rate, neuron_indices=neuron_indices,
        training=True, key=k_drop))
    assert jnp.allclose(out_s, xs * ref_mask[None, :], atol=1e-6)

    # --- Case 4: eval-mode path is the identity ---
    out_eval = selective_dropout(
        x, dropout_rate=dropout_rate, neuron_indices=neuron_indices,
        training=False, key=k_drop)
    assert jnp.array_equal(out_eval, x)

    print("KERNEL_OK")
</pallas_src>

<mosaic_0001>
module attributes {stable_mosaic.version = 11 : i64} {
  func.func @_selective_dropout_kernel(%arg0: i32, %arg1: memref<32x8192xf32, #tpu.memory_space<vmem>>, %arg2: memref<1x8192xf32, #tpu.memory_space<vmem>>, %arg3: memref<32x8192xf32, #tpu.memory_space<vmem>>) attributes {dimension_semantics = [#tpu.dimension_semantics<parallel>], iteration_bounds = array<i64: 2>, scalar_prefetch = 0 : i64, scratch_operands = 0 : i64, tpu.core_type = #tpu.core_type<tc>, window_params = [{transform_indices = @transform_0, window_bounds = array<i64: 32, 8192>}, {pipeline_mode = #tpu.pipeline_mode<synchronous>, transform_indices = @transform_1, window_bounds = array<i64: 1, 8192>}, {transform_indices = @transform_2, window_bounds = array<i64: 32, 8192>}]} {
    %c0 = arith.constant 0 : index
    %c0_0 = arith.constant 0 : index
    %0 = vector.load %arg1[%c0, %c0_0] : memref<32x8192xf32, #tpu.memory_space<vmem>>, vector<32x8192xf32>
    %c0_1 = arith.constant 0 : index
    %c0_2 = arith.constant 0 : index
    %1 = vector.load %arg2[%c0_1, %c0_2] : memref<1x8192xf32, #tpu.memory_space<vmem>>, vector<1x8192xf32>
    %2 = vector.broadcast %1 : vector<1x8192xf32> to vector<32x8192xf32>
    %3 = arith.mulf %0, %2 : vector<32x8192xf32>
    %c0_3 = arith.constant 0 : index
    %c0_4 = arith.constant 0 : index
    %4 = vector.load %arg3[%c0_3, %c0_4] : memref<32x8192xf32, #tpu.memory_space<vmem>>, vector<32x8192xf32>
    tpu.vector_store %arg3[%c0_3, %c0_4], %3 {strides = array<i32>} : memref<32x8192xf32, #tpu.memory_space<vmem>>, vector<32x8192xf32>,
    return
  }
  func.func @transform_0(%arg0: i32) -> (i32, i32) {
    %c0_i32 = arith.constant 0 : i32
    %c0_i32_0 = arith.constant 0 : i32
    return %arg0, %c0_i32 : i32, i32
  }
  func.func @transform_1(%arg0: i32) -> (i32, i32) {
    %c0_i32 = arith.constant 0 : i32
    %c0_i32_0 = arith.constant 0 : i32
    %c0_i32_1 = arith.constant 0 : i32
    return %c0_i32, %c0_i32_0 : i32, i32
  }
  func.func @transform_2(%arg0: i32) -> (i32, i32) {
    %c0_i32 = arith.constant 0 : i32
    %c0_i32_0 = arith.constant 0 : i32
    return %arg0, %c0_i32 : i32, i32
  }
}

</mosaic_0001>

<bundles_post_ra>
// kernel: _apply_mask_pallas.1
= control target key start
LH: loop header
LB: loop body
LE: loop exit
PB: predicated region body
PF: predicated region fallthrough
CT: control target
= control target key end

     0   :  { %7 = vsyncpa [#allocation3], 0  ;;  %s2802_s0 = inlined_call_operand.hbm [shape: f32[64,8192], index: 0, kind: input, shape index: {}]   ;;  %s2803_s1 = inlined_call_operand.hbm [shape: f32[1,8192], index: 1, kind: input, shape index: {}]   ;;  %s2804_s2 = inlined_call_operand.hbm [shape: f32[64,8192], index: 2, kind: output, shape index: {}]  }
   0x1   :  { %9 = vsyncpa [#allocation3 + $0x1], 0 }
   0x2   :  { %10 = vsyncpa [#allocation6], 0 }
   0x3   :  { %11 = vsyncpa [#allocation4], 0 }
   0x4   :  { %13 = vsyncpa [#allocation4 + $0x1], 0  ;;  %s1615_s9 = smov 0   ;;  %s1617_s10 = smov 0  }
   0x5   :  { %s1619_s11 = smov 0   ;;  %s1621_s12 = smov 0  }
   0x6 LB: > { %s1636_s13 = sadd.s32 4294967295, %s1591_s12   ;;  %s1380_s14 = sadd.s32 4294967294, %s1591_s12   ;;  %s1591_s12 = sphi %s1621_s12, %s3024_s12   ;;  %s1587_s11 = sphi %s1619_s11, %s3023_s11   ;;  %s1583_s10 = sphi %s1617_s10, %s3022_s10   ;;  %s1579_s9 = sphi %s1615_s9, %s3021_s9  }
   0x7   : > { %s1640_s15 = sadd.s32 1, %s1591_s12   ;;  %s26_s16 = sadd.s32 1, %s1587_s11 }
   0x8   : > { %s23_s17 = ssub.s32 %s1591_s12, %s1640_s15  ;;  %p33_p0 = scmp.ne.s32.totalorder %s1587_s11, %s1583_s10 }
   0x9   : > { %p24_p1 = scmp.eq.s32.totalorder %s23_s17, 0  ;;  %p34_p2 = scmp.eq.s32.totalorder %s1591_s12, 0 }
   0xa   : > { %p39_p3 = scmp.ne.s32.totalorder %s1583_s10, %s1579_s9  ;;  %p2805_p4 = scmp.eq.s32.totalorder %s1636_s13, 0 }
   0xb   : > { %s1652_s18 = scalar_select %p24_p1, %s1587_s11, %s26_s16  }
   0xc   : > { %p1654_p5 = por %p34_p2, %p33_p0  ;;  %p1660_p6 = por %p2805_p4, %p39_p3 }
   0xd   : > { %p84_p7 = scmp.eq.s32.totalorder %s1636_s13, 1  ;;  %p90_p8 = scmp.eq.s32.totalorder %s1380_s14, 1 }
   0xe   : > { %s2892_s20 = scalar_select %p1660_p6, 1, 0 }
   0xf   : > { %p1381_p9 = scmp.ge.s32.totalorder %s1591_s12, 1  ;;  %p97_p10 = scmp.lt.s32.totalorder %s1591_s12, 3 }
  0x10   : > { %p1667_p11 = por %p84_p7, %p33_p0  ;;  %p1671_p12 = por %p90_p8, %p39_p3 }
  0x11   : > { %p1675_p13 = pnand %p1381_p9, %p97_p10  ;;  %s1593_s24 = smov [#allocation5]  }
  0x12   : > { %s2893_s21 = scalar_select %p1667_p11, 1, 0 }
  0x13   : > { %s2894_s22 = scalar_select %p1671_p12, 1, 0 }
  0x14   : > { %s2895_s23 = scalar_select %p1675_p13, 1, 0 }
  0x15   : > { %p1410_p2 = pneg %p1675_p13  ;;  %s110_s25 = sshll.u32 %s1593_s24, 4  ;;  %s111_s25 = int_to_ptr.vmem [resolvable:$true] %s110_s25 }
  0x16   : > { %p1423_p4 = scmp.lt.s32.totalorder %s1591_s12, 2  ;;  %p2896_p0 = scmp.eq.s32.totalorder %s1636_s13, 0 }
  0x17   : > { %s121_s27 = sand.u32 1, %s1587_s11   ;;  %s1463_s4 = scalar_lea.hbm %s2803_s1, 1024 }
  0x18   : > { %p1685_p7 = pnand %p1410_p2, %p2896_p0  ;;  %p1692_p3 = pnand %p1423_p4, %p1654_p5 }
  0x19   : > { %s1384_s29 = sshll.u32 %s121_s27, 11  ;;  %p1464_p8 = scmp.ne.s32.totalorder %s2803_s1, %s1463_s4 }
  0x1a   : > { %s2898_s28 = scalar_select %p1692_p3, 1, 0 }
  0x1b   : > { %p1465_p9 = pneg %p1685_p7  ;;  %p1470_p4 = scmp.lt.u32.totalorder %s1463_s4, %s2803_s1 }
  0x1d   : > { %p1466_p10 = pnand %p1465_p9, %p1464_p8 }
  0x1f   : > { %p1467_p2 = pneg %p1466_p10 }
  0x21   : > { %p1472_p5 = pnand %p1470_p4, %p1467_p2 }
  0x23   : > { %1475 = shalt.err (!%p1472_p5)
}
  0x24   : > { %s1476_s14 = scalar_lea.vmem %s111_s25, 1024  ;;  %p1484_p11 = scmp.lt.s32.totalorder %s111_s25, %s111_s25 }
  0x25   : > { %p1477_p0 = scmp.ne.s32.totalorder %s111_s25, %s1476_s14  ;;  %p1485_p6 = scmp.lt.s32.totalorder %s1476_s14, %s1476_s14 }
  0x27   : > { %p1479_p1 = pnand %p1477_p0, %p1465_p9  ;;  %p1486_p13 = por %p1485_p6, %p1484_p11 }
  0x29   : > { %p1480_p12 = pneg %p1479_p1 }
  0x2b   : > { %p1487_p3 = pnand %p1486_p13, %p1480_p12 }
  0x2d   : > { %1490 = shalt.err (!%p1487_p3)
}
  0x2e   : > { %1413 = dma.hbm_to_vmem [thread:$0]  (!%p1685_p7), %s2803_s1, 1024, %s111_s25, [#allocation6]  }
  0x2f   : > { %s1399_s19 = sshll.u32 %s1591_s12, 15  ;;  %s125_s24 = scalar_lea.vmem [#allocation2], %s1384_s29 }
  0x30   : > { %s133_s30 = sshll.u32 %s125_s24, 4  ;;  %s1716_s5 = scalar_lea.hbm %s2802_s0, %s1399_s19  ;;  %s1718_s30 = int_to_ptr.vmem [resolvable:$true] %s133_s30 }
  0x31   : > { %s1720_s26 = scalar_lea.sflag [#allocation3], %s121_s27  ;;  %s1491_s6 = scalar_lea.hbm %s1716_s5, 32768 }
  0x32   : > { %p1492_p6 = scmp.ne.s32.totalorder %s1716_s5, %s1491_s6  ;;  %p2899_p11 = scmp.ne.s32.totalorder %s2898_s28, 0 }
  0x33   : > { %s1496_s7 = scalar_lea.hbm %s2802_s0, 65536  ;;  %p1497_p7 = scmp.lt.u32.totalorder %s1716_s5, %s2802_s0 }
  0x34   : > { %p1493_p12 = pneg %p2899_p11  ;;  %p1498_p3 = scmp.lt.u32.totalorder %s1496_s7, %s1491_s6 }
  0x35   : > { %p1500_p9 = scmp.lt.u32.totalorder %s1491_s6, %s1716_s5 }
  0x36   : > { %p1494_p13 = pnand %p1493_p12, %p1492_p6  ;;  %p1499_p8 = por %p1498_p3, %p1497_p7 }
  0x38   : > { %p1495_p1 = pneg %p1494_p13  ;;  %p1501_p10 = por %p1500_p9, %p1499_p8 }
  0x3a   : > { %p1502_p2 = pnand %p1501_p10, %p1495_p1 }
  0x3c   : > { %1505 = shalt.err (!%p1502_p2)
}
  0x3d   : > { %s1506_s27 = scalar_lea.vmem %s1718_s30, 32768  ;;  %s1594_s16 = smov [#allocation2]  }
  0x3e   : > { %p1507_p4 = scmp.ne.s32.totalorder %s1718_s30, %s1506_s27  ;;  %s1511_s17 = sshll.u32 %s1594_s16, 4  ;;  %s1512_s17 = int_to_ptr.vmem [resolvable:$false] %s1511_s17 }
  0x3f   : > { %s1513_s19 = scalar_lea.vmem %s1512_s17, 65536  ;;  %p1514_p6 = scmp.lt.s32.totalorder %s1718_s30, %s1512_s17 }
  0x40   : > { %p1509_p5 = pnand %p1507_p4, %p1493_p12  ;;  %p1515_p13 = scmp.lt.s32.totalorder %s1513_s19, %s1506_s27 }
  0x42   : > { %p1510_p0 = pneg %p1509_p5  ;;  %p1516_p7 = por %p1515_p13, %p1514_p6 }
  0x44   : > { %p1517_p3 = pnand %p1516_p7, %p1510_p0 }
  0x46   : > { %1520 = shalt.err (!%p1517_p3)
}
  0x47   : > { %s1595_s24 = smov 8192   ;;  %s1596_s3 = smov 512  }
  0x48   : > { %1417 = dma.hbm_to_vmem [thread:$0]  (!%p2899_p11), %s1716_s5, 32768, %s1718_s30, %s1720_s26, %s1595_s24, %s1595_s24, %s1596_s3  }
  0x49   : > { %p2900_p12 = scmp.ne.s32.totalorder %s2895_s23, 0 }
  0x4b   : > { %145 = sbr.rel (%p2900_p12) target bundleno = 275 (0x113), region = 28 }
  0x52   : > { %s1751_s4 = sand.u32 1, %s1583_s10   ;;  %p2901_p1 = scmp.ne.s32.totalorder %s2892_s20, 0 }
  0x53   : > { %s1389_s6 = sshll.u32 %s1751_s4, 11  ;;  %s148_s25 = scalar_lea.sflag [#allocation3], %s1751_s4 }
  0x54   : > { %s1757_s29 = scalar_lea.vmem [#allocation2], %s1389_s6 }
  0x55   : > { %1566 = dma.done.wait (%p2901_p1), %s148_s25, 32768  }
  0x56   : > { %1568 = vsyncadd (%p2901_p1), %s148_s25, 4294934528  ;;  %p2902_p11 = scmp.eq.s32.totalorder %s1636_s13, 0 }
  0x58   : > { %1570 = dma.done.wait (%p2902_p11), [#allocation6], 1024   ;;  %p2903_p8 = pmov %p2902_p11 }
  0x59   : > { %v450_v0 = vlaneseq  ;;  %v178_v10 = vld [vmem:[%s1757_s29] sm:$0xff]  ;;  %v179_v12 = vld [vmem:[%s1757_s29 + $0x8] sm:$0xff]  ;;  %v180_v15 = vld [vmem:[%s1757_s29 + $0x10] sm:$0xff]  ;;  %s1830_s20 = scalar_lea.vmem [#allocation7], %s1389_s6  ;;  %s1401_s23 = sshll.u32 %s1636_s13, 15 }
  0x5a   : > { %1572 = vsyncadd (%p2903_p8), [#allocation6], 4294966272  ;;  %v434_v11 = vld [vmem:[#allocation5] sm:$0xff]  ;;  %v181_v17 = vld [vmem:[%s1757_s29 + $0x18] sm:$0xff]  ;;  %s1297_s28 = sshll.u32 %s1830_s20, 4  ;;  %s2742_s26 = scalar_lea.hbm %s2804_s2, %s1401_s23  ;;  %s2746_s28 = int_to_ptr.vmem [resolvable:$true] %s1297_s28 }
  0x5b   : > { %v451_v1 = vshrl.u32 %v450_v0, 7  ;;  %v182_v19 = vld [vmem:[%s1757_s29 + $0x20] sm:$0xff]  ;;  %v183_v21 = vld [vmem:[%s1757_s29 + $0x28] sm:$0xff]  ;;  %v184_v23 = vld [vmem:[%s1757_s29 + $0x30] sm:$0xff]  ;;  %s1283_s13 = scalar_lea.sflag [#allocation4], %s1751_s4  ;;  %s1521_s7 = scalar_lea.vmem %s2746_s28, 32768 }
  0x5c   : > { %v185_v25 = vld [vmem:[%s1757_s29 + $0x38] sm:$0xff]  ;;  %v186_v31 = vld [vmem:[%s1757_s29 + $0x40] sm:$0xff]  ;;  %v435_v32 = vld [vmem:[#allocation5 + $0x8] sm:$0xff]  ;;  %p1522_p9 = scmp.ne.s32.totalorder %s2746_s28, %s1521_s7  ;;  %p3018_p10 = scmp.ne.s32.totalorder %s2893_s21, 0 }
  0x5d   : > { %v1767_v2 = vsub.s32 0, %v451_v1  ;;  %v1769_v3 = vsub.s32 1, %v451_v1  ;;  %v1771_v4 = vsub.s32 2, %v451_v1  ;;  %v1773_v5 = vsub.s32 3, %v451_v1  ;;  %v187_v33 = vld [vmem:[%s1757_s29 + $0x48] sm:$0xff]  ;;  %v188_v38 = vld [vmem:[%s1757_s29 + $0x50] sm:$0xff] }
  0x5e   : > { %v1775_v6 = vsub.s32 4, %v451_v1  ;;  %v1777_v7 = vsub.s32 5, %v451_v1  ;;  %v1779_v8 = vsub.s32 6, %v451_v1  ;;  %v1781_v9 = vsub.s32 7, %v451_v1  ;;  %v189_v39 = vld [vmem:[%s1757_s29 + $0x58] sm:$0xff]  ;;  %v190_v40 = vld [vmem:[%s1757_s29 + $0x60] sm:$0xff]  ;;  %p1523_p2 = pnand %p1522_p9, %p3018_p10 }
  0x5f   : > { %v1786_v13 = vrot.slane %v434_v11, %v1767_v2  ;;  %v1789_v14 = vrot.slane %v434_v11, %v1769_v3  ;;  %v1793_v16 = vrot.slane %v434_v11, %v1771_v4  ;;  %v1797_v18 = vrot.slane %v434_v11, %v1773_v5  ;;  %v191_v45 = vld [vmem:[%s1757_s29 + $0x68] sm:$0xff]  ;;  %v192_v46 = vld [vmem:[%s1757_s29 + $0x70] sm:$0xff]  ;;  %v193_v47 = vld [vmem:[%s1757_s29 + $0x78] sm:$0xff]  ;;  %s1597_s8 = smov [#allocation7]  }
  0x60   : > { %v1801_v20 = vrot.slane %v434_v11, %v1775_v6  ;;  %v1805_v22 = vrot.slane %v434_v11, %v1777_v7  ;;  %v1809_v24 = vrot.slane %v434_v11, %v1779_v8  ;;  %v1813_v26 = vrot.slane %v434_v11, %v1781_v9  ;;  %v436_v52 = vld [vmem:[#allocation5 + $0x10] sm:$0xff]  ;;  %v194_v57 = vld [vmem:[%s1757_s29 + $0x80] sm:$0xff]  ;;  %v195_v58 = vld [vmem:[%s1757_s29 + $0x88] sm:$0xff]  ;;  %p1524_p4 = pneg %p1523_p2  ;;  %s1525_s14 = sshll.u32 %s1597_s8, 4  ;;  %s1526_s14 = int_to_ptr.vmem [resolvable:$false] %s1525_s14 }
  0x61   : > { %v770_v27 = vmul.f32 %v1786_v13, %v178_v10  ;;  %v771_v28 = vmul.f32 %v1789_v14, %v179_v12  ;;  %v772_v29 = vmul.f32 %v1793_v16, %v180_v15  ;;  %v773_v30 = vmul.f32 %v1797_v18, %v181_v17  ;;  %v196_v63 = vld [vmem:[%s1757_s29 + $0x90] sm:$0xff]  ;;  %v197_v0 = vld [vmem:[%s1757_s29 + $0x98] sm:$0xff]  ;;  %v198_v1 = vld [vmem:[%s1757_s29 + $0xa0] sm:$0xff]  ;;  %s1527_s27 = scalar_lea.vmem %s1526_s14, 65536  ;;  %p1528_p5 = scmp.lt.s32.totalorder %s2746_s28, %s1526_s14 }
  0x62   : > { %v774_v34 = vmul.f32 %v1801_v20, %v182_v19  ;;  %v775_v35 = vmul.f32 %v1805_v22, %v183_v21  ;;  %v776_v36 = vmul.f32 %v1809_v24, %v184_v23  ;;  %v777_v37 = vmul.f32 %v1813_v26, %v185_v25  ;;  %v199_v17 = vld [vmem:[%s1757_s29 + $0xa8] sm:$0xff]  ;;  %v200_v19 = vld [vmem:[%s1757_s29 + $0xb0] sm:$0xff]  ;;  %v201_v21 = vld [vmem:[%s1757_s29 + $0xb8] sm:$0xff]  ;;  %p1529_p0 = scmp.lt.s32.totalorder %s1527_s27, %s1521_s7 }
  0x63   : > { %1026 = vst [vmem:[%s1830_s20] sm:$0xff] %v770_v27  ;;  %1027 = vst [vmem:[%s1830_s20 + $0x8] sm:$0xff] %v771_v28  ;;  %v1837_v41 = vrot.slane %v435_v32, %v1767_v2  ;;  %v1840_v42 = vrot.slane %v435_v32, %v1769_v3  ;;  %v1843_v43 = vrot.slane %v435_v32, %v1771_v4 }
  0x64   : > { %1028 = vst [vmem:[%s1830_s20 + $0x10] sm:$0xff] %v772_v29  ;;  %1029 = vst [vmem:[%s1830_s20 + $0x18] sm:$0xff] %v773_v30  ;;  %v1846_v44 = vrot.slane %v435_v32, %v1773_v5  ;;  %v1856_v48 = vrot.slane %v435_v32, %v1775_v6  ;;  %v1859_v49 = vrot.slane %v435_v32, %v1777_v7  ;;  %v437_v29 = vld [vmem:[#allocation5 + $0x18] sm:$0xff]  ;;  %p1530_p6 = por %p1529_p0, %p1528_p5 }
  0x65   : > { %1030 = vst [vmem:[%s1830_s20 + $0x20] sm:$0xff] %v774_v34  ;;  %1031 = vst [vmem:[%s1830_s20 + $0x28] sm:$0xff] %v775_v35  ;;  %v1862_v50 = vrot.slane %v435_v32, %v1779_v8  ;;  %v1865_v51 = vrot.slane %v435_v32, %v1781_v9  ;;  %v778_v53 = vmul.f32 %v1837_v41, %v186_v31  ;;  %v202_v34 = vld [vmem:[%s1757_s29 + $0xc0] sm:$0xff]  ;;  %v203_v35 = vld [vmem:[%s1757_s29 + $0xc8] sm:$0xff] }
  0x66   : > { %1032 = vst [vmem:[%s1830_s20 + $0x30] sm:$0xff] %v776_v36  ;;  %1033 = vst [vmem:[%s1830_s20 + $0x38] sm:$0xff] %v777_v37  ;;  %v779_v54 = vmul.f32 %v1840_v42, %v187_v33  ;;  %v780_v55 = vmul.f32 %v1843_v43, %v188_v38  ;;  %v781_v56 = vmul.f32 %v1846_v44, %v189_v39  ;;  %p1531_p13 = pnand %p1530_p6, %p1524_p4 }
  0x67   : > { %v782_v59 = vmul.f32 %v1856_v48, %v190_v40  ;;  %v783_v60 = vmul.f32 %v1859_v49, %v191_v45  ;;  %v784_v61 = vmul.f32 %v1862_v50, %v192_v46  ;;  %v785_v62 = vmul.f32 %v1865_v51, %v193_v47  ;;  %1034 = vst [vmem:[%s1830_s20 + $0x40] sm:$0xff] %v778_v53  ;;  %v204_v40 = vld [vmem:[%s1757_s29 + $0xd0] sm:$0xff]  ;;  %v205_v45 = vld [vmem:[%s1757_s29 + $0xd8] sm:$0xff]  ;;  %v206_v46 = vld [vmem:[%s1757_s29 + $0xe0] sm:$0xff] }
  0x68   : > { %1035 = vst [vmem:[%s1830_s20 + $0x48] sm:$0xff] %v779_v54  ;;  %1036 = vst [vmem:[%s1830_s20 + $0x50] sm:$0xff] %v780_v55  ;;  %v1885_v10 = vrot.slane %v436_v52, %v1767_v2  ;;  %v1888_v11 = vrot.slane %v436_v52, %v1769_v3  ;;  %v1891_v12 = vrot.slane %v436_v52, %v1771_v4  ;;  %v207_v55 = vld [vmem:[%s1757_s29 + $0xe8] sm:$0xff] }
  0x69   : > { %1037 = vst [vmem:[%s1830_s20 + $0x58] sm:$0xff] %v781_v56  ;;  %v1894_v15 = vrot.slane %v436_v52, %v1773_v5  ;;  %1038 = vst [vmem:[%s1830_s20 + $0x60] sm:$0xff] %v782_v59  ;;  %v1904_v23 = vrot.slane %v436_v52, %v1775_v6  ;;  %v1907_v25 = vrot.slane %v436_v52, %v1777_v7  ;;  %v208_v56 = vld [vmem:[%s1757_s29 + $0xf0] sm:$0xff] }
  0x6a   : > { %1039 = vst [vmem:[%s1830_s20 + $0x68] sm:$0xff] %v783_v60  ;;  %1040 = vst [vmem:[%s1830_s20 + $0x70] sm:$0xff] %v784_v61  ;;  %v1910_v27 = vrot.slane %v436_v52, %v1779_v8  ;;  %v1913_v28 = vrot.slane %v436_v52, %v1781_v9  ;;  %v786_v30 = vmul.f32 %v1885_v10, %v194_v57  ;;  %v209_v57 = vld [vmem:[%s1757_s29 + $0xf8] sm:$0xff] }
  0x6b   : > { %1041 = vst [vmem:[%s1830_s20 + $0x78] sm:$0xff] %v785_v62  ;;  %2904 = vst [vmem:[#allocation11_spill] sm:$0xff] %v1907_v25  ;;  %v787_v31 = vmul.f32 %v1888_v11, %v195_v58  ;;  %v788_v32 = vmul.f32 %v1891_v12, %v196_v63  ;;  %v789_v33 = vmul.f32 %v1894_v15, %v197_v0  ;;  %v438_v62 = vld [vmem:[#allocation5 + $0x20] sm:$0xff] }
  0x6c   : > { %2905 = vst [vmem:[#allocation12_spill] sm:$0xff] %v1910_v27  ;;  %2906 = vst [vmem:[#allocation13_spill] sm:$0xff] %v1913_v28  ;;  %v790_v36 = vmul.f32 %v1904_v23, %v198_v1  ;;  %v791_v37 = vmul.f32 %v1907_v25, %v199_v17  ;;  %v792_v38 = vmul.f32 %v1910_v27, %v200_v19  ;;  %v210_v19 = vld [vmem:[%s1757_s29 + $0x100] sm:$0xff] }
  0x6d   : > { %v793_v39 = vmul.f32 %v1913_v28, %v201_v21  ;;  %1042 = vst [vmem:[%s1830_s20 + $0x80] sm:$0xff] %v786_v30  ;;  %1043 = vst [vmem:[%s1830_s20 + $0x88] sm:$0xff] %v787_v31  ;;  %v1933_v47 = vrot.slane %v437_v29, %v1767_v2  ;;  %v1936_v52 = vrot.slane %v437_v29, %v1769_v3  ;;  %v211_v21 = vld [vmem:[%s1757_s29 + $0x108] sm:$0xff] }
  0x6e   : > { %1044 = vst [vmem:[%s1830_s20 + $0x90] sm:$0xff] %v788_v32  ;;  %1045 = vst [vmem:[%s1830_s20 + $0x98] sm:$0xff] %v789_v33  ;;  %v1939_v53 = vrot.slane %v437_v29, %v1771_v4  ;;  %v1942_v54 = vrot.slane %v437_v29, %v1773_v5  ;;  %v1952_v58 = vrot.slane %v437_v29, %v1775_v6  ;;  %v212_v33 = vld [vmem:[%s1757_s29 + $0x110] sm:$0xff] }
  0x6f   : > { %2907 = vst [vmem:[#allocation14_spill] sm:$0xff] %v1933_v47  ;;  %2908 = vst [vmem:[#allocation15_spill] sm:$0xff] %v1936_v52  ;;  %v1955_v59 = vrot.slane %v437_v29, %v1777_v7  ;;  %v1958_v60 = vrot.slane %v437_v29, %v1779_v8  ;;  %v1961_v61 = vrot.slane %v437_v29, %v1781_v9 }
  0x70   : > { %2909 = vst [vmem:[#allocation16_spill] sm:$0xff] %v1939_v53  ;;  %2910 = vst [vmem:[#allocation17_spill] sm:$0xff] %v1942_v54  ;;  %v794_v63 = vmul.f32 %v1933_v47, %v202_v34  ;;  %v795_v0 = vmul.f32 %v1936_v52, %v203_v35  ;;  %v796_v1 = vmul.f32 %v1939_v53, %v204_v40  ;;  %v213_v34 = vld [vmem:[%s1757_s29 + $0x118] sm:$0xff]  ;;  %v214_v35 = vld [vmem:[%s1757_s29 + $0x120] sm:$0xff] }
  0x71   : > { %1046 = vst [vmem:[%s1830_s20 + $0xa0] sm:$0xff] %v790_v36  ;;  %1047 = vst [vmem:[%s1830_s20 + $0xa8] sm:$0xff] %v791_v37  ;;  %v797_v17 = vmul.f32 %v1942_v54, %v205_v45  ;;  %v798_v30 = vmul.f32 %v1952_v58, %v206_v46  ;;  %v799_v29 = vmul.f32 %v1955_v59, %v207_v55  ;;  %v215_v40 = vld [vmem:[%s1757_s29 + $0x128] sm:$0xff]  ;;  %v216_v45 = vld [vmem:[%s1757_s29 + $0x130] sm:$0xff] }
  0x72   : > { %1048 = vst [vmem:[%s1830_s20 + $0xb0] sm:$0xff] %v792_v38  ;;  %1049 = vst [vmem:[%s1830_s20 + $0xb8] sm:$0xff] %v793_v39  ;;  %v800_v31 = vmul.f32 %v1958_v60, %v208_v56  ;;  %v801_v32 = vmul.f32 %v1961_v61, %v209_v57  ;;  %v1981_v36 = vrot.slane %v438_v62, %v1767_v2  ;;  %v217_v46 = vld [vmem:[%s1757_s29 + $0x138] sm:$0xff] }
  0x73   : > { %2911 = vst [vmem:[#allocation18_spill] sm:$0xff] %v1952_v58  ;;  %2912 = vst [vmem:[#allocation19_spill] sm:$0xff] %v1955_v59  ;;  %v1984_v37 = vrot.slane %v438_v62, %v1769_v3  ;;  %v1987_v38 = vrot.slane %v438_v62, %v1771_v4  ;;  %v1990_v39 = vrot.slane %v438_v62, %v1773_v5  ;;  %v240_v58 = vld [vmem:[%s1757_s29 + $0x1f0] sm:$0xff]  ;;  %v241_v54 = vld [vmem:[%s1757_s29 + $0x1f8] sm:$0xff] }
  0x74   : > { %2913 = vst [vmem:[#allocation20_spill] sm:$0xff] %v1958_v60  ;;  %2914 = vst [vmem:[#allocation21_spill] sm:$0xff] %v1961_v61  ;;  %v2000_v55 = vrot.slane %v438_v62, %v1775_v6  ;;  %v2003_v56 = vrot.slane %v438_v62, %v1777_v7  ;;  %v2006_v57 = vrot.slane %v438_v62, %v1779_v8 }
  0x75   : > { %1050 = vst [vmem:[%s1830_s20 + $0xc0] sm:$0xff] %v794_v63  ;;  %1051 = vst [vmem:[%s1830_s20 + $0xc8] sm:$0xff] %v795_v0  ;;  %v2009_v63 = vrot.slane %v438_v62, %v1781_v9  ;;  %v439_v0 = vld [vmem:[#allocation5 + $0x28] sm:$0xff] }
  0x76   : > { %1052 = vst [vmem:[%s1830_s20 + $0xd0] sm:$0xff] %v796_v1  ;;  %1053 = vst [vmem:[%s1830_s20 + $0xd8] sm:$0xff] %v797_v17  ;;  %v802_v1 = vmul.f32 %v1981_v36, %v210_v19  ;;  %v803_v17 = vmul.f32 %v1984_v37, %v211_v21  ;;  %v806_v61 = vmul.f32 %v2000_v55, %v214_v35  ;;  %v220_v21 = vld [vmem:[%s1757_s29 + $0x150] sm:$0xff] }
  0x77   : > { %2915 = vst [vmem:[#allocation22_spill] sm:$0xff] %v1981_v36  ;;  %2916 = vst [vmem:[#allocation23_spill] sm:$0xff] %v1984_v37  ;;  %v807_v62 = vmul.f32 %v2003_v56, %v215_v40  ;;  %v808_v60 = vmul.f32 %v2006_v57, %v216_v45  ;;  %v809_v19 = vmul.f32 %v2009_v63, %v217_v46  ;;  %v228_v37 = vld [vmem:[%s1757_s29 + $0x190] sm:$0xff] }
  0x78   : > { %2917 = vst [vmem:[#allocation24_spill] sm:$0xff] %v1987_v38  ;;  %2918 = vst [vmem:[#allocation25_spill] sm:$0xff] %v1990_v39  ;;  %v2029_v35 = vrot.slane %v439_v0, %v1767_v2  ;;  %v2032_v40 = vrot.slane %v439_v0, %v1769_v3  ;;  %v2035_v45 = vrot.slane %v439_v0, %v1771_v4 }
  0x79   : > { %1054 = vst [vmem:[%s1830_s20 + $0xe0] sm:$0xff] %v798_v30  ;;  %1055 = vst [vmem:[%s1830_s20 + $0xe8] sm:$0xff] %v799_v29  ;;  %v804_v30 = vmul.f32 %v1987_v38, %v212_v33  ;;  %v805_v29 = vmul.f32 %v1990_v39, %v213_v34  ;;  %v221_v33 = vld [vmem:[%s1757_s29 + $0x158] sm:$0xff]  ;;  %v222_v34 = vld [vmem:[%s1757_s29 + $0x160] sm:$0xff]  ;;  %v2038_v46 = vrot.slane %v439_v0, %v1773_v5 }
  0x7a   : > { %1056 = vst [vmem:[%s1830_s20 + $0xf0] sm:$0xff] %v800_v31  ;;  %1057 = vst [vmem:[%s1830_s20 + $0xf8] sm:$0xff] %v801_v32  ;;  %v218_v31 = vld [vmem:[%s1757_s29 + $0x140] sm:$0xff]  ;;  %v219_v32 = vld [vmem:[%s1757_s29 + $0x148] sm:$0xff] }
  0x7b   : > { %2919 = vst [vmem:[#allocation26_spill] sm:$0xff] %v2000_v55  ;;  %2920 = vst [vmem:[#allocation27_spill] sm:$0xff] %v2003_v56  ;;  %v2057_v56 = vrot.slane %v439_v0, %v1781_v9  ;;  %v813_v55 = vmul.f32 %v2038_v46, %v221_v33  ;;  %v226_v39 = vld [vmem:[%s1757_s29 + $0x180] sm:$0xff]  ;;  %v227_v38 = vld [vmem:[%s1757_s29 + $0x188] sm:$0xff] }
  0x7c   : > { %2921 = vst [vmem:[#allocation28_spill] sm:$0xff] %v2006_v57  ;;  %2922 = vst [vmem:[#allocation29_spill] sm:$0xff] %v2009_v63  ;;  %v223_v63 = vld [vmem:[%s1757_s29 + $0x168] sm:$0xff]  ;;  %v224_v57 = vld [vmem:[%s1757_s29 + $0x170] sm:$0xff] }
  0x7d   : > { %1058 = vst [vmem:[%s1830_s20 + $0x100] sm:$0xff] %v802_v1  ;;  %1059 = vst [vmem:[%s1830_s20 + $0x108] sm:$0xff] %v803_v17  ;;  %v225_v1 = vld [vmem:[%s1757_s29 + $0x178] sm:$0xff]  ;;  %v2048_v17 = vrot.slane %v439_v0, %v1775_v6  ;;  %v231_v33 = vld [vmem:[%s1757_s29 + $0x1a8] sm:$0xff] }
  0x7e   : > { %1060 = vst [vmem:[%s1830_s20 + $0x110] sm:$0xff] %v804_v30  ;;  %1061 = vst [vmem:[%s1830_s20 + $0x118] sm:$0xff] %v805_v29  ;;  %v2051_v30 = vrot.slane %v439_v0, %v1777_v7  ;;  %v2054_v29 = vrot.slane %v439_v0, %v1779_v8 }
  0x7f   : > { %2923 = vst [vmem:[#allocation30_spill] sm:$0xff] %v2029_v35  ;;  %2924 = vst [vmem:[#allocation31_spill] sm:$0xff] %v2032_v40  ;;  %v814_v0 = vmul.f32 %v2048_v17, %v222_v34 }
  0x80   : > { %2925 = vst [vmem:[#allocation32_spill] sm:$0xff] %v2035_v45  ;;  %2926 = vst [vmem:[#allocation33_spill] sm:$0xff] %v2038_v46  ;;  %v815_v36 = vmul.f32 %v2051_v30, %v223_v63  ;;  %v816_v59 = vmul.f32 %v2054_v29, %v224_v57 }
  0x81   : > { %1062 = vst [vmem:[%s1830_s20 + $0x120] sm:$0xff] %v806_v61  ;;  %1063 = vst [vmem:[%s1830_s20 + $0x128] sm:$0xff] %v807_v62  ;;  %v440_v61 = vld [vmem:[#allocation5 + $0x30] sm:$0xff]  ;;  %v811_v62 = vmul.f32 %v2032_v40, %v219_v32  ;;  %v229_v32 = vld [vmem:[%s1757_s29 + $0x198] sm:$0xff] }
  0x82   : > { %1064 = vst [vmem:[%s1830_s20 + $0x130] sm:$0xff] %v808_v60  ;;  %1065 = vst [vmem:[%s1830_s20 + $0x138] sm:$0xff] %v809_v19  ;;  %v810_v60 = vmul.f32 %v2029_v35, %v218_v31  ;;  %v812_v19 = vmul.f32 %v2035_v45, %v220_v21  ;;  %v817_v31 = vmul.f32 %v2057_v56, %v225_v1  ;;  %v230_v21 = vld [vmem:[%s1757_s29 + $0x1a0] sm:$0xff]  ;;  %v239_v35 = vld [vmem:[%s1757_s29 + $0x1e8] sm:$0xff] }
  0x83   : > { %2927 = vst [vmem:[#allocation34_spill] sm:$0xff] %v2048_v17  ;;  %2928 = vst [vmem:[#allocation35_spill] sm:$0xff] %v2051_v30  ;;  %v2078_v34 = vrot.slane %v440_v61, %v1767_v2  ;;  %v2081_v57 = vrot.slane %v440_v61, %v1769_v3  ;;  %v2084_v63 = vrot.slane %v440_v61, %v1771_v4  ;;  %v238_v40 = vld [vmem:[%s1757_s29 + $0x1e0] sm:$0xff] }
  0x84   : > { %2929 = vst [vmem:[#allocation36_spill] sm:$0xff] %v2054_v29  ;;  %2930 = vst [vmem:[#allocation37_spill] sm:$0xff] %v2057_v56  ;;  %v2087_v1 = vrot.slane %v440_v61, %v1773_v5  ;;  %v2099_v56 = vrot.slane %v440_v61, %v1777_v7  ;;  %v2102_v29 = vrot.slane %v440_v61, %v1779_v8 }
  0x85   : > { %1066 = vst [vmem:[%s1830_s20 + $0x140] sm:$0xff] %v810_v60  ;;  %1067 = vst [vmem:[%s1830_s20 + $0x148] sm:$0xff] %v811_v62  ;;  %v232_v60 = vld [vmem:[%s1757_s29 + $0x1b0] sm:$0xff]  ;;  %v233_v62 = vld [vmem:[%s1757_s29 + $0x1b8] sm:$0xff]  ;;  %v2105_v30 = vrot.slane %v440_v61, %v1781_v9  ;;  %v818_v17 = vmul.f32 %v2078_v34, %v226_v39  ;;  %v819_v46 = vmul.f32 %v2081_v57, %v227_v38 }
  0x86   : > { %1068 = vst [vmem:[%s1830_s20 + $0x150] sm:$0xff] %v812_v19  ;;  %1069 = vst [vmem:[%s1830_s20 + $0x158] sm:$0xff] %v813_v55  ;;  %v441_v19 = vld [vmem:[#allocation5 + $0x38] sm:$0xff]  ;;  %v2096_v55 = vrot.slane %v440_v61, %v1775_v6  ;;  %v820_v45 = vmul.f32 %v2084_v63, %v228_v37  ;;  %v821_v61 = vmul.f32 %v2087_v1, %v229_v32  ;;  %v242_v37 = vld [vmem:[%s1757_s29 + $0x200] sm:$0xff] }
  0x87   : > { %2931 = vst [vmem:[#allocation38_spill] sm:$0xff] %v2078_v34  ;;  %2932 = vst [vmem:[#allocation39_spill] sm:$0xff] %v2081_v57  ;;  %v823_v52 = vmul.f32 %v2099_v56, %v231_v33  ;;  %v824_v39 = vmul.f32 %v2102_v29, %v232_v60  ;;  %v825_v38 = vmul.f32 %v2105_v30, %v233_v62  ;;  %v243_v32 = vld [vmem:[%s1757_s29 + $0x208] sm:$0xff] }
  0x88   : > { %2933 = vst [vmem:[#allocation40_spill] sm:$0xff] %v2084_v63  ;;  %2934 = vst [vmem:[#allocation41_spill] sm:$0xff] %v2087_v1  ;;  %v822_v53 = vmul.f32 %v2096_v55, %v230_v21  ;;  %v244_v1 = vld [vmem:[%s1757_s29 + $0x210] sm:$0xff]  ;;  %v245_v63 = vld [vmem:[%s1757_s29 + $0x218] sm:$0xff]  ;;  %v2132_v21 = vrot.slane %v441_v19, %v1767_v2  ;;  %v2135_v33 = vrot.slane %v441_v19, %v1769_v3 }
  0x89   : > { %1070 = vst [vmem:[%s1830_s20 + $0x160] sm:$0xff] %v814_v0  ;;  %1071 = vst [vmem:[%s1830_s20 + $0x168] sm:$0xff] %v815_v36  ;;  %v234_v0 = vld [vmem:[%s1757_s29 + $0x1c0] sm:$0xff]  ;;  %v235_v36 = vld [vmem:[%s1757_s29 + $0x1c8] sm:$0xff]  ;;  %v2138_v60 = vrot.slane %v441_v19, %v1771_v4  ;;  %v2141_v62 = vrot.slane %v441_v19, %v1773_v5  ;;  %v2152_v2 = vrot.slane %v441_v19, %v1775_v6 }
  0x8a   : > { %1072 = vst [vmem:[%s1830_s20 + $0x170] sm:$0xff] %v816_v59  ;;  %1073 = vst [vmem:[%s1830_s20 + $0x178] sm:$0xff] %v817_v31  ;;  %v236_v59 = vld [vmem:[%s1757_s29 + $0x1d0] sm:$0xff]  ;;  %v237_v31 = vld [vmem:[%s1757_s29 + $0x1d8] sm:$0xff]  ;;  %v2155_v3 = vrot.slane %v441_v19, %v1777_v7  ;;  %v2158_v4 = vrot.slane %v441_v19, %v1779_v8  ;;  %v2161_v5 = vrot.slane %v441_v19, %v1781_v9 }
  0x8b   : > { %2935 = vst [vmem:[#allocation42_spill] sm:$0xff] %v2096_v55  ;;  %2936 = vst [vmem:[#allocation43_spill] sm:$0xff] %v2099_v56  ;;  %v826_v6 = vmul.f32 %v2132_v21, %v234_v0  ;;  %v827_v7 = vmul.f32 %v2135_v33, %v235_v36  ;;  %v828_v8 = vmul.f32 %v2138_v60, %v236_v59  ;;  %v254_v19 = vld [vmem:[%s1757_s29 + $0x260] sm:$0xff]  ;;  %v257_v56 = vld [vmem:[%s1757_s29 + $0x278] sm:$0xff] }
  0x8c   : > { %2937 = vst [vmem:[#allocation44_spill] sm:$0xff] %v2102_v29  ;;  %2938 = vst [vmem:[#allocation45_spill] sm:$0xff] %v2105_v30  ;;  %v829_v9 = vmul.f32 %v2141_v62, %v237_v31  ;;  %v255_v30 = vld [vmem:[%s1757_s29 + $0x268] sm:$0xff]  ;;  %v256_v29 = vld [vmem:[%s1757_s29 + $0x270] sm:$0xff]  ;;  %v830_v55 = vmul.f32 %v2152_v2, %v238_v40  ;;  %v831_v57 = vmul.f32 %v2155_v3, %v239_v35 }
  0x8d   : > { %1074 = vst [vmem:[%s1830_s20 + $0x180] sm:$0xff] %v818_v17  ;;  %1075 = vst [vmem:[%s1830_s20 + $0x188] sm:$0xff] %v819_v46  ;;  %v246_v17 = vld [vmem:[%s1757_s29 + $0x220] sm:$0xff]  ;;  %v247_v46 = vld [vmem:[%s1757_s29 + $0x228] sm:$0xff]  ;;  %v832_v0 = vmul.f32 %v2158_v4, %v240_v58  ;;  %v833_v36 = vmul.f32 %v2161_v5, %v241_v54  ;;  %v834_v35 = vmul.f32 %v1786_v13, %v242_v37 }
  0x8e   : > { %1076 = vst [vmem:[%s1830_s20 + $0x190] sm:$0xff] %v820_v45  ;;  %1077 = vst [vmem:[%s1830_s20 + $0x198] sm:$0xff] %v821_v61  ;;  %v248_v45 = vld [vmem:[%s1757_s29 + $0x230] sm:$0xff]  ;;  %v249_v61 = vld [vmem:[%s1757_s29 + $0x238] sm:$0xff]  ;;  %v835_v58 = vmul.f32 %v1789_v14, %v243_v32  ;;  %v836_v54 = vmul.f32 %v1793_v16, %v244_v1  ;;  %v837_v40 = vmul.f32 %v1797_v18, %v245_v63 }
  0x8f   : > { %2939 = vst [vmem:[#allocation46_spill] sm:$0xff] %v2138_v60  ;;  %2940 = vst [vmem:[#allocation47_spill] sm:$0xff] %v2141_v62  ;;  %v258_v59 = vld [vmem:[%s1757_s29 + $0x280] sm:$0xff]  ;;  %v259_v31 = vld [vmem:[%s1757_s29 + $0x288] sm:$0xff]  ;;  %v838_v37 = vmul.f32 %v1801_v20, %v246_v17  ;;  %v839_v1 = vmul.f32 %v1805_v22, %v247_v46  ;;  %v840_v63 = vmul.f32 %v1809_v24, %v248_v45 }
  0x90   : > { %1078 = vst [vmem:[%s1830_s20 + $0x1a0] sm:$0xff] %v822_v53  ;;  %1079 = vst [vmem:[%s1830_s20 + $0x1a8] sm:$0xff] %v823_v52  ;;  %v250_v53 = vld [vmem:[%s1757_s29 + $0x240] sm:$0xff]  ;;  %v251_v52 = vld [vmem:[%s1757_s29 + $0x248] sm:$0xff]  ;;  %v841_v32 = vmul.f32 %v1813_v26, %v249_v61 }
  0x91   : > { %1080 = vst [vmem:[%s1830_s20 + $0x1b0] sm:$0xff] %v824_v39  ;;  %1081 = vst [vmem:[%s1830_s20 + $0x1b8] sm:$0xff] %v825_v38  ;;  %v252_v39 = vld [vmem:[%s1757_s29 + $0x250] sm:$0xff]  ;;  %v253_v38 = vld [vmem:[%s1757_s29 + $0x258] sm:$0xff]  ;;  %v842_v17 = vmul.f32 %v1837_v41, %v250_v53  ;;  %v843_v46 = vmul.f32 %v1840_v42, %v251_v52  ;;  %v846_v53 = vmul.f32 %v1856_v48, %v254_v19 }
  0x92   : > { %2941 = vst [vmem:[#allocation48_spill] sm:$0xff] %v2158_v4  ;;  %2942 = vst [vmem:[#allocation49_spill] sm:$0xff] %v2161_v5  ;;  %v260_v62 = vld [vmem:[%s1757_s29 + $0x290] sm:$0xff]  ;;  %v261_v60 = vld [vmem:[%s1757_s29 + $0x298] sm:$0xff]  ;;  %v844_v45 = vmul.f32 %v1843_v43, %v252_v39  ;;  %v845_v61 = vmul.f32 %v1846_v44, %v253_v38  ;;  %v847_v52 = vmul.f32 %v1859_v49, %v255_v30 }
  0x93   : > { %1082 = vst [vmem:[%s1830_s20 + $0x1c0] sm:$0xff] %v826_v6  ;;  %1083 = vst [vmem:[%s1830_s20 + $0x1c8] sm:$0xff] %v827_v7  ;;  %v262_v5 = vld [vmem:[%s1757_s29 + $0x2a0] sm:$0xff]  ;;  %v263_v4 = vld [vmem:[%s1757_s29 + $0x2a8] sm:$0xff]  ;;  %v848_v39 = vmul.f32 %v1862_v50, %v256_v29  ;;  %v849_v38 = vmul.f32 %v1865_v51, %v257_v56  ;;  %v850_v30 = vmul.f32 %v1885_v10, %v258_v59 }
  0x94   : > { %1084 = vst [vmem:[%s1830_s20 + $0x1d0] sm:$0xff] %v828_v8  ;;  %1085 = vst [vmem:[%s1830_s20 + $0x1d8] sm:$0xff] %v829_v9  ;;  %v264_v6 = vld [vmem:[%s1757_s29 + $0x2b0] sm:$0xff]  ;;  %v265_v7 = vld [vmem:[%s1757_s29 + $0x2b8] sm:$0xff]  ;;  %v851_v29 = vmul.f32 %v1888_v11, %v259_v31  ;;  %v852_v56 = vmul.f32 %v1891_v12, %v260_v62  ;;  %v853_v19 = vmul.f32 %v1894_v15, %v261_v60 }
  0x95   : > { %1086 = vst [vmem:[%s1830_s20 + $0x1e0] sm:$0xff] %v830_v55  ;;  %1087 = vst [vmem:[%s1830_s20 + $0x1e8] sm:$0xff] %v831_v57  ;;  %v266_v8 = vld [vmem:[%s1757_s29 + $0x2c0] sm:$0xff]  ;;  %v267_v9 = vld [vmem:[%s1757_s29 + $0x2c8] sm:$0xff]  ;;  %v854_v59 = vmul.f32 %v1904_v23, %v262_v5  ;;  %v855_v62 = vmul.f32 %v1907_v25, %v263_v4  ;;  %v856_v60 = vmul.f32 %v1910_v27, %v264_v6 }
  0x96   : > { %1088 = vst [vmem:[%s1830_s20 + $0x1f0] sm:$0xff] %v832_v0  ;;  %1089 = vst [vmem:[%s1830_s20 + $0x1f8] sm:$0xff] %v833_v36  ;;  %v268_v55 = vld [vmem:[%s1757_s29 + $0x2d0] sm:$0xff]  ;;  %v269_v57 = vld [vmem:[%s1757_s29 + $0x2d8] sm:$0xff]  ;;  %v857_v31 = vmul.f32 %v1913_v28, %v265_v7  ;;  %v858_v4 = vmul.f32 %v1933_v47, %v266_v8 }
  0x97   : > { %1090 = vst [vmem:[%s1830_s20 + $0x200] sm:$0xff] %v834_v35  ;;  %1091 = vst [vmem:[%s1830_s20 + $0x208] sm:$0xff] %v835_v58  ;;  %v270_v0 = vld [vmem:[%s1757_s29 + $0x2e0] sm:$0xff]  ;;  %v271_v36 = vld [vmem:[%s1757_s29 + $0x2e8] sm:$0xff] }
  0x98   : > { %1092 = vst [vmem:[%s1830_s20 + $0x210] sm:$0xff] %v836_v54  ;;  %1093 = vst [vmem:[%s1830_s20 + $0x218] sm:$0xff] %v837_v40  ;;  %v272_v35 = vld [vmem:[%s1757_s29 + $0x2f0] sm:$0xff]  ;;  %v273_v58 = vld [vmem:[%s1757_s29 + $0x2f8] sm:$0xff] }
  0x99   : > { %1094 = vst [vmem:[%s1830_s20 + $0x220] sm:$0xff] %v838_v37  ;;  %1095 = vst [vmem:[%s1830_s20 + $0x228] sm:$0xff] %v839_v1  ;;  %v274_v54 = vld [vmem:[%s1757_s29 + $0x300] sm:$0xff]  ;;  %v275_v40 = vld [vmem:[%s1757_s29 + $0x308] sm:$0xff] }
  0x9a   : > { %1096 = vst [vmem:[%s1830_s20 + $0x230] sm:$0xff] %v840_v63  ;;  %1097 = vst [vmem:[%s1830_s20 + $0x238] sm:$0xff] %v841_v32  ;;  %v276_v37 = vld [vmem:[%s1757_s29 + $0x310] sm:$0xff]  ;;  %v277_v1 = vld [vmem:[%s1757_s29 + $0x318] sm:$0xff] }
  0x9b   : > { %1098 = vst [vmem:[%s1830_s20 + $0x240] sm:$0xff] %v842_v17  ;;  %1099 = vst [vmem:[%s1830_s20 + $0x248] sm:$0xff] %v843_v46  ;;  %v278_v63 = vld [vmem:[%s1757_s29 + $0x320] sm:$0xff]  ;;  %v279_v32 = vld [vmem:[%s1757_s29 + $0x328] sm:$0xff] }
  0x9c   : > { %1100 = vst [vmem:[%s1830_s20 + $0x250] sm:$0xff] %v844_v45  ;;  %1101 = vst [vmem:[%s1830_s20 + $0x258] sm:$0xff] %v845_v61  ;;  %v280_v17 = vld [vmem:[%s1757_s29 + $0x330] sm:$0xff]  ;;  %v281_v46 = vld [vmem:[%s1757_s29 + $0x338] sm:$0xff] }
  0x9d   : > { %1102 = vst [vmem:[%s1830_s20 + $0x260] sm:$0xff] %v846_v53  ;;  %1103 = vst [vmem:[%s1830_s20 + $0x268] sm:$0xff] %v847_v52  ;;  %v282_v45 = vld [vmem:[%s1757_s29 + $0x340] sm:$0xff]  ;;  %v283_v61 = vld [vmem:[%s1757_s29 + $0x348] sm:$0xff] }
  0x9e   : > { %1104 = vst [vmem:[%s1830_s20 + $0x270] sm:$0xff] %v848_v39  ;;  %1105 = vst [vmem:[%s1830_s20 + $0x278] sm:$0xff] %v849_v38  ;;  %v284_v53 = vld [vmem:[%s1757_s29 + $0x350] sm:$0xff]  ;;  %v285_v52 = vld [vmem:[%s1757_s29 + $0x358] sm:$0xff] }
  0x9f   : > { %1106 = vst [vmem:[%s1830_s20 + $0x280] sm:$0xff] %v850_v30  ;;  %1107 = vst [vmem:[%s1830_s20 + $0x288] sm:$0xff] %v851_v29  ;;  %v2943_v5 = vld [vmem:[#allocation15_spill] sm:$0xff]  ;;  %v2944_v39 = vld [vmem:[#allocation16_spill] sm:$0xff] }
  0xa0   : > { %1108 = vst [vmem:[%s1830_s20 + $0x290] sm:$0xff] %v852_v56  ;;  %1109 = vst [vmem:[%s1830_s20 + $0x298] sm:$0xff] %v853_v19  ;;  %v859_v6 = vmul.f32 %v2943_v5, %v267_v9  ;;  %v860_v7 = vmul.f32 %v2944_v39, %v268_v55  ;;  %v2945_v38 = vld [vmem:[#allocation17_spill] sm:$0xff]  ;;  %v286_v27 = vld [vmem:[%s1757_s29 + $0x360] sm:$0xff] }
  0xa1   : > { %v861_v28 = vmul.f32 %v2945_v38, %v269_v57  ;;  %v287_v25 = vld [vmem:[%s1757_s29 + $0x368] sm:$0xff]  ;;  %v288_v30 = vld [vmem:[%s1757_s29 + $0x370] sm:$0xff]  ;;  %v289_v29 = vld [vmem:[%s1757_s29 + $0x378] sm:$0xff]  ;;  %1110 = vst [vmem:[%s1830_s20 + $0x2a0] sm:$0xff] %v854_v59 }
  0xa2   : > { %1111 = vst [vmem:[%s1830_s20 + $0x2a8] sm:$0xff] %v855_v62  ;;  %1112 = vst [vmem:[%s1830_s20 + $0x2b0] sm:$0xff] %v856_v60  ;;  %v2946_v8 = vld [vmem:[#allocation18_spill] sm:$0xff]  ;;  %v2947_v56 = vld [vmem:[#allocation19_spill] sm:$0xff] }
  0xa3   : > { %1113 = vst [vmem:[%s1830_s20 + $0x2b8] sm:$0xff] %v857_v31  ;;  %v862_v9 = vmul.f32 %v2946_v8, %v270_v0  ;;  %v863_v55 = vmul.f32 %v2947_v56, %v271_v36  ;;  %v2948_v19 = vld [vmem:[#allocation20_spill] sm:$0xff]  ;;  %v2949_v38 = vld [vmem:[#allocation21_spill] sm:$0xff]  ;;  %v290_v5 = vld [vmem:[%s1757_s29 + $0x380] sm:$0xff] }
  0xa4   : > { %v864_v57 = vmul.f32 %v2948_v19, %v272_v35  ;;  %v865_v39 = vmul.f32 %v2949_v38, %v273_v58  ;;  %v291_v47 = vld [vmem:[%s1757_s29 + $0x388] sm:$0xff]  ;;  %v292_v59 = vld [vmem:[%s1757_s29 + $0x390] sm:$0xff]  ;;  %1114 = vst [vmem:[%s1830_s20 + $0x2c0] sm:$0xff] %v858_v4  ;;  %1115 = vst [vmem:[%s1830_s20 + $0x2c8] sm:$0xff] %v859_v6 }
  0xa5   : > { %1116 = vst [vmem:[%s1830_s20 + $0x2d0] sm:$0xff] %v860_v7  ;;  %1117 = vst [vmem:[%s1830_s20 + $0x2d8] sm:$0xff] %v861_v28  ;;  %v2950_v0 = vld [vmem:[#allocation22_spill] sm:$0xff]  ;;  %v2951_v36 = vld [vmem:[#allocation23_spill] sm:$0xff] }
  0xa6   : > { %v866_v62 = vmul.f32 %v2950_v0, %v274_v54  ;;  %v867_v60 = vmul.f32 %v2951_v36, %v275_v40  ;;  %v2952_v35 = vld [vmem:[#allocation24_spill] sm:$0xff]  ;;  %v2953_v58 = vld [vmem:[#allocation25_spill] sm:$0xff]  ;;  %v293_v19 = vld [vmem:[%s1757_s29 + $0x398] sm:$0xff]  ;;  %1118 = vst [vmem:[%s1830_s20 + $0x2e0] sm:$0xff] %v862_v9 }
  0xa7   : > { %v868_v31 = vmul.f32 %v2952_v35, %v276_v37  ;;  %v869_v38 = vmul.f32 %v2953_v58, %v277_v1  ;;  %v294_v56 = vld [vmem:[%s1757_s29 + $0x3a0] sm:$0xff]  ;;  %v295_v4 = vld [vmem:[%s1757_s29 + $0x3a8] sm:$0xff]  ;;  %1119 = vst [vmem:[%s1830_s20 + $0x2e8] sm:$0xff] %v863_v55  ;;  %1120 = vst [vmem:[%s1830_s20 + $0x2f0] sm:$0xff] %v864_v57 }
  0xa8   : > { %1121 = vst [vmem:[%s1830_s20 + $0x2f8] sm:$0xff] %v865_v39  ;;  %v2954_v28 = vld [vmem:[#allocation26_spill] sm:$0xff]  ;;  %v2955_v40 = vld [vmem:[#allocation27_spill] sm:$0xff]  ;;  %v2956_v37 = vld [vmem:[#allocation28_spill] sm:$0xff] }
  0xa9   : > { %v870_v54 = vmul.f32 %v2954_v28, %v278_v63  ;;  %v871_v6 = vmul.f32 %v2955_v40, %v279_v32  ;;  %v872_v7 = vmul.f32 %v2956_v37, %v280_v17  ;;  %v2957_v1 = vld [vmem:[#allocation29_spill] sm:$0xff]  ;;  %v297_v36 = vld [vmem:[%s1757_s29 + $0x3b8] sm:$0xff]  ;;  %v298_v9 = vld [vmem:[%s1757_s29 + $0x3c0] sm:$0xff]  ;;  %1122 = vst [vmem:[%s1830_s20 + $0x300] sm:$0xff] %v866_v62 }
  0xaa   : > { %v873_v58 = vmul.f32 %v2957_v1, %v281_v46  ;;  %v296_v35 = vld [vmem:[%s1757_s29 + $0x3b0] sm:$0xff]  ;;  %1123 = vst [vmem:[%s1830_s20 + $0x308] sm:$0xff] %v867_v60  ;;  %1124 = vst [vmem:[%s1830_s20 + $0x310] sm:$0xff] %v868_v31  ;;  %v2958_v63 = vld [vmem:[#allocation30_spill] sm:$0xff] }
  0xab   : > { %1125 = vst [vmem:[%s1830_s20 + $0x318] sm:$0xff] %v869_v38  ;;  %v874_v39 = vmul.f32 %v2958_v63, %v282_v45  ;;  %v2959_v32 = vld [vmem:[#allocation31_spill] sm:$0xff]  ;;  %v2960_v17 = vld [vmem:[#allocation32_spill] sm:$0xff]  ;;  %v2961_v46 = vld [vmem:[#allocation33_spill] sm:$0xff] }
  0xac   : > { %v875_v55 = vmul.f32 %v2959_v32, %v283_v61  ;;  %v876_v57 = vmul.f32 %v2960_v17, %v284_v53  ;;  %v877_v1 = vmul.f32 %v2961_v46, %v285_v52  ;;  %v299_v37 = vld [vmem:[%s1757_s29 + $0x3c8] sm:$0xff]  ;;  %v300_v40 = vld [vmem:[%s1757_s29 + $0x3d0] sm:$0xff]  ;;  %v301_v62 = vld [vmem:[%s1757_s29 + $0x3d8] sm:$0xff]  ;;  %1126 = vst [vmem:[%s1830_s20 + $0x320] sm:$0xff] %v870_v54 }
  0xad   : > { %1127 = vst [vmem:[%s1830_s20 + $0x328] sm:$0xff] %v871_v6  ;;  %1128 = vst [vmem:[%s1830_s20 + $0x330] sm:$0xff] %v872_v7  ;;  %v2962_v45 = vld [vmem:[#allocation34_spill] sm:$0xff]  ;;  %v2963_v61 = vld [vmem:[#allocation35_spill] sm:$0xff] }
  0xae   : > { %1129 = vst [vmem:[%s1830_s20 + $0x338] sm:$0xff] %v873_v58  ;;  %v878_v38 = vmul.f32 %v2962_v45, %v286_v27  ;;  %v879_v60 = vmul.f32 %v2963_v61, %v287_v25  ;;  %v2964_v53 = vld [vmem:[#allocation36_spill] sm:$0xff]  ;;  %v2965_v52 = vld [vmem:[#allocation37_spill] sm:$0xff]  ;;  %v302_v17 = vld [vmem:[%s1757_s29 + $0x3e0] sm:$0xff]  ;;  %v882_v27 = vmul.f32 %v2078_v34, %v290_v5 }
  0xaf   : > { %v880_v31 = vmul.f32 %v2964_v53, %v288_v30  ;;  %v881_v46 = vmul.f32 %v2965_v52, %v289_v29  ;;  %v303_v32 = vld [vmem:[%s1757_s29 + $0x3e8] sm:$0xff]  ;;  %v304_v54 = vld [vmem:[%s1757_s29 + $0x3f0] sm:$0xff]  ;;  %1130 = vst [vmem:[%s1830_s20 + $0x340] sm:$0xff] %v874_v39  ;;  %1131 = vst [vmem:[%s1830_s20 + $0x348] sm:$0xff] %v875_v55 }
  0xb0   : > { %1132 = vst [vmem:[%s1830_s20 + $0x350] sm:$0xff] %v876_v57  ;;  %1133 = vst [vmem:[%s1830_s20 + $0x358] sm:$0xff] %v877_v1  ;;  %v2966_v25 = vld [vmem:[#allocation39_spill] sm:$0xff]  ;;  %v2967_v30 = vld [vmem:[#allocation40_spill] sm:$0xff] }
  0xb1   : > { %v883_v58 = vmul.f32 %v2966_v25, %v291_v47  ;;  %v884_v6 = vmul.f32 %v2967_v30, %v292_v59  ;;  %v2968_v29 = vld [vmem:[#allocation41_spill] sm:$0xff]  ;;  %v305_v52 = vld [vmem:[%s1757_s29 + $0x3f8] sm:$0xff]  ;;  %v306_v53 = vld [vmem:[%s1757_s29 + $0x400] sm:$0xff]  ;;  %1134 = vst [vmem:[%s1830_s20 + $0x360] sm:$0xff] %v878_v38 }
  0xb2   : > { %v885_v7 = vmul.f32 %v2968_v29, %v293_v19  ;;  %v307_v39 = vld [vmem:[%s1757_s29 + $0x408] sm:$0xff]  ;;  %1135 = vst [vmem:[%s1830_s20 + $0x368] sm:$0xff] %v879_v60  ;;  %1136 = vst [vmem:[%s1830_s20 + $0x370] sm:$0xff] %v880_v31  ;;  %v2969_v5 = vld [vmem:[#allocation42_spill] sm:$0xff] }
  0xb3   : > { %1137 = vst [vmem:[%s1830_s20 + $0x378] sm:$0xff] %v881_v46  ;;  %v886_v1 = vmul.f32 %v2969_v5, %v294_v56  ;;  %v2970_v47 = vld [vmem:[#allocation43_spill] sm:$0xff]  ;;  %v2971_v59 = vld [vmem:[#allocation44_spill] sm:$0xff]  ;;  %v2972_v19 = vld [vmem:[#allocation45_spill] sm:$0xff]  ;;  %v890_v56 = vmul.f32 %v2132_v21, %v298_v9  ;;  %v894_v9 = vmul.f32 %v2152_v2, %v302_v17  ;;  %v898_v17 = vmul.f32 %v1786_v13, %v306_v53 }
  0xb4   : > { %v887_v55 = vmul.f32 %v2970_v47, %v295_v4  ;;  %v888_v57 = vmul.f32 %v2971_v59, %v296_v35  ;;  %v889_v29 = vmul.f32 %v2972_v19, %v297_v36  ;;  %v308_v30 = vld [vmem:[%s1757_s29 + $0x410] sm:$0xff]  ;;  %v309_v25 = vld [vmem:[%s1757_s29 + $0x418] sm:$0xff]  ;;  %v310_v38 = vld [vmem:[%s1757_s29 + $0x420] sm:$0xff]  ;;  %1138 = vst [vmem:[%s1830_s20 + $0x380] sm:$0xff] %v882_v27  ;;  %v891_v4 = vmul.f32 %v2135_v33, %v299_v37 }
  0xb5   : > { %1139 = vst [vmem:[%s1830_s20 + $0x388] sm:$0xff] %v883_v58  ;;  %1140 = vst [vmem:[%s1830_s20 + $0x390] sm:$0xff] %v884_v6  ;;  %v2973_v35 = vld [vmem:[#allocation46_spill] sm:$0xff]  ;;  %v2974_v36 = vld [vmem:[#allocation47_spill] sm:$0xff]  ;;  %v895_v37 = vmul.f32 %v2155_v3, %v303_v32  ;;  %v899_v32 = vmul.f32 %v1789_v14, %v307_v39  ;;  %v902_v53 = vmul.f32 %v1801_v20, %v310_v38 }
  0xb6   : > { %1141 = vst [vmem:[%s1830_s20 + $0x398] sm:$0xff] %v885_v7  ;;  %v892_v46 = vmul.f32 %v2973_v35, %v300_v40  ;;  %v893_v60 = vmul.f32 %v2974_v36, %v301_v62  ;;  %v311_v31 = vld [vmem:[%s1757_s29 + $0x428] sm:$0xff]  ;;  %v312_v19 = vld [vmem:[%s1757_s29 + $0x430] sm:$0xff]  ;;  %v313_v27 = vld [vmem:[%s1757_s29 + $0x438] sm:$0xff] }
  0xb7   : > { %1142 = vst [vmem:[%s1830_s20 + $0x3a0] sm:$0xff] %v886_v1  ;;  %1143 = vst [vmem:[%s1830_s20 + $0x3a8] sm:$0xff] %v887_v55  ;;  %v2975_v40 = vld [vmem:[#allocation48_spill] sm:$0xff]  ;;  %v2976_v62 = vld [vmem:[#allocation49_spill] sm:$0xff]  ;;  %v903_v39 = vmul.f32 %v1805_v22, %v311_v31 }
  0xb8   : > { %1144 = vst [vmem:[%s1830_s20 + $0x3b0] sm:$0xff] %v888_v57  ;;  %1145 = vst [vmem:[%s1830_s20 + $0x3b8] sm:$0xff] %v889_v29  ;;  %v896_v58 = vmul.f32 %v2975_v40, %v304_v54  ;;  %v897_v6 = vmul.f32 %v2976_v62, %v305_v52  ;;  %v314_v7 = vld [vmem:[%s1757_s29 + $0x440] sm:$0xff]  ;;  %v315_v36 = vld [vmem:[%s1757_s29 + $0x448] sm:$0xff]  ;;  %v900_v54 = vmul.f32 %v1793_v16, %v308_v30 }
  0xb9   : > { %v316_v1 = vld [vmem:[%s1757_s29 + $0x450] sm:$0xff]  ;;  %1146 = vst [vmem:[%s1830_s20 + $0x3c0] sm:$0xff] %v890_v56  ;;  %1147 = vst [vmem:[%s1830_s20 + $0x3c8] sm:$0xff] %v891_v4  ;;  %v901_v52 = vmul.f32 %v1797_v18, %v309_v25  ;;  %v317_v29 = vld [vmem:[%s1757_s29 + $0x458] sm:$0xff]  ;;  %v904_v30 = vmul.f32 %v1809_v24, %v312_v19  ;;  %v905_v25 = vmul.f32 %v1813_v26, %v313_v27 }
  0xba   : > { %1148 = vst [vmem:[%s1830_s20 + $0x3d0] sm:$0xff] %v892_v46  ;;  %1149 = vst [vmem:[%s1830_s20 + $0x3d8] sm:$0xff] %v893_v60  ;;  %v318_v55 = vld [vmem:[%s1757_s29 + $0x460] sm:$0xff]  ;;  %v319_v57 = vld [vmem:[%s1757_s29 + $0x468] sm:$0xff]  ;;  %v906_v38 = vmul.f32 %v1837_v41, %v314_v7  ;;  %v907_v60 = vmul.f32 %v1840_v42, %v315_v36  ;;  %v908_v19 = vmul.f32 %v1843_v43, %v316_v1 }
  0xbb   : > { %1150 = vst [vmem:[%s1830_s20 + $0x3e0] sm:$0xff] %v894_v9  ;;  %1151 = vst [vmem:[%s1830_s20 + $0x3e8] sm:$0xff] %v895_v37  ;;  %v320_v56 = vld [vmem:[%s1757_s29 + $0x470] sm:$0xff]  ;;  %v321_v4 = vld [vmem:[%s1757_s29 + $0x478] sm:$0xff]  ;;  %v909_v31 = vmul.f32 %v1846_v44, %v317_v29  ;;  %v911_v36 = vmul.f32 %v1859_v49, %v319_v57 }
  0xbc   : > { %1152 = vst [vmem:[%s1830_s20 + $0x3f0] sm:$0xff] %v896_v58  ;;  %1153 = vst [vmem:[%s1830_s20 + $0x3f8] sm:$0xff] %v897_v6  ;;  %v322_v46 = vld [vmem:[%s1757_s29 + $0x480] sm:$0xff]  ;;  %v323_v27 = vld [vmem:[%s1757_s29 + $0x488] sm:$0xff]  ;;  %v910_v58 = vmul.f32 %v1856_v48, %v318_v55  ;;  %v912_v6 = vmul.f32 %v1862_v50, %v320_v56  ;;  %v913_v7 = vmul.f32 %v1865_v51, %v321_v4 }
  0xbd   : > { %1154 = vst [vmem:[%s1830_s20 + $0x400] sm:$0xff] %v898_v17  ;;  %1155 = vst [vmem:[%s1830_s20 + $0x408] sm:$0xff] %v899_v32  ;;  %v324_v9 = vld [vmem:[%s1757_s29 + $0x490] sm:$0xff]  ;;  %v325_v37 = vld [vmem:[%s1757_s29 + $0x498] sm:$0xff] }
  0xbe   : > { %1156 = vst [vmem:[%s1830_s20 + $0x410] sm:$0xff] %v900_v54  ;;  %1157 = vst [vmem:[%s1830_s20 + $0x418] sm:$0xff] %v901_v52  ;;  %v326_v1 = vld [vmem:[%s1757_s29 + $0x4a0] sm:$0xff]  ;;  %v327_v17 = vld [vmem:[%s1757_s29 + $0x4a8] sm:$0xff]  ;;  %v914_v54 = vmul.f32 %v1885_v10, %v322_v46  ;;  %v915_v52 = vmul.f32 %v1888_v11, %v323_v27  ;;  %v916_v29 = vmul.f32 %v1891_v12, %v324_v9 }
  0xbf   : > { %1158 = vst [vmem:[%s1830_s20 + $0x420] sm:$0xff] %v902_v53  ;;  %1159 = vst [vmem:[%s1830_s20 + $0x428] sm:$0xff] %v903_v39  ;;  %v328_v32 = vld [vmem:[%s1757_s29 + $0x4b0] sm:$0xff]  ;;  %v917_v55 = vmul.f32 %v1894_v15, %v325_v37  ;;  %v329_v57 = vld [vmem:[%s1757_s29 + $0x4b8] sm:$0xff] }
  0xc0   : > { %1160 = vst [vmem:[%s1830_s20 + $0x430] sm:$0xff] %v904_v30  ;;  %1161 = vst [vmem:[%s1830_s20 + $0x438] sm:$0xff] %v905_v25  ;;  %v330_v53 = vld [vmem:[%s1757_s29 + $0x4c0] sm:$0xff]  ;;  %v331_v39 = vld [vmem:[%s1757_s29 + $0x4c8] sm:$0xff]  ;;  %v918_v30 = vmul.f32 %v1904_v23, %v326_v1 }
  0xc1   : > { %1162 = vst [vmem:[%s1830_s20 + $0x440] sm:$0xff] %v906_v38  ;;  %1163 = vst [vmem:[%s1830_s20 + $0x448] sm:$0xff] %v907_v60  ;;  %v2977_v25 = vld [vmem:[#allocation11_spill] sm:$0xff]  ;;  %v2978_v4 = vld [vmem:[#allocation12_spill] sm:$0xff] }
  0xc2   : > { %1164 = vst [vmem:[%s1830_s20 + $0x450] sm:$0xff] %v908_v19  ;;  %1165 = vst [vmem:[%s1830_s20 + $0x458] sm:$0xff] %v909_v31  ;;  %v919_v56 = vmul.f32 %v2977_v25, %v327_v17  ;;  %v920_v46 = vmul.f32 %v2978_v4, %v328_v32  ;;  %v2979_v38 = vld [vmem:[#allocation13_spill] sm:$0xff]  ;;  %v333_v31 = vld [vmem:[%s1757_s29 + $0x4d8] sm:$0xff] }
  0xc3   : > { %1166 = vst [vmem:[%s1830_s20 + $0x460] sm:$0xff] %v910_v58  ;;  %1167 = vst [vmem:[%s1830_s20 + $0x468] sm:$0xff] %v911_v36  ;;  %v921_v60 = vmul.f32 %v2979_v38, %v329_v57  ;;  %v332_v19 = vld [vmem:[%s1757_s29 + $0x4d0] sm:$0xff]  ;;  %v334_v27 = vld [vmem:[%s1757_s29 + $0x4e0] sm:$0xff] }
  0xc4   : > { %1168 = vst [vmem:[%s1830_s20 + $0x470] sm:$0xff] %v912_v6  ;;  %1169 = vst [vmem:[%s1830_s20 + $0x478] sm:$0xff] %v913_v7  ;;  %v2980_v9 = vld [vmem:[#allocation14_spill] sm:$0xff]  ;;  %v2981_v58 = vld [vmem:[#allocation15_spill] sm:$0xff] }
  0xc5   : > { %1170 = vst [vmem:[%s1830_s20 + $0x480] sm:$0xff] %v914_v54  ;;  %1171 = vst [vmem:[%s1830_s20 + $0x488] sm:$0xff] %v915_v52  ;;  %v922_v37 = vmul.f32 %v2980_v9, %v330_v53  ;;  %v923_v36 = vmul.f32 %v2981_v58, %v331_v39  ;;  %v2982_v6 = vld [vmem:[#allocation16_spill] sm:$0xff]  ;;  %v2983_v1 = vld [vmem:[#allocation17_spill] sm:$0xff]  ;;  %v926_v52 = vmul.f32 %v2946_v8, %v334_v27 }
  0xc6   : > { %1172 = vst [vmem:[%s1830_s20 + $0x490] sm:$0xff] %v916_v29  ;;  %1173 = vst [vmem:[%s1830_s20 + $0x498] sm:$0xff] %v917_v55  ;;  %v924_v7 = vmul.f32 %v2982_v6, %v332_v19  ;;  %v925_v17 = vmul.f32 %v2983_v1, %v333_v31  ;;  %v335_v32 = vld [vmem:[%s1757_s29 + $0x4e8] sm:$0xff]  ;;  %v336_v57 = vld [vmem:[%s1757_s29 + $0x4f0] sm:$0xff] }
  0xc7   : > { %v337_v54 = vld [vmem:[%s1757_s29 + $0x4f8] sm:$0xff]  ;;  %1174 = vst [vmem:[%s1830_s20 + $0x4a0] sm:$0xff] %v918_v30  ;;  %1175 = vst [vmem:[%s1830_s20 + $0x4a8] sm:$0xff] %v919_v56  ;;  %v2984_v29 = vld [vmem:[#allocation19_spill] sm:$0xff] }
  0xc8   : > { %1176 = vst [vmem:[%s1830_s20 + $0x4b0] sm:$0xff] %v920_v46  ;;  %1177 = vst [vmem:[%s1830_s20 + $0x4b8] sm:$0xff] %v921_v60  ;;  %v927_v55 = vmul.f32 %v2984_v29, %v335_v32  ;;  %v2985_v53 = vld [vmem:[#allocation20_spill] sm:$0xff]  ;;  %v2986_v19 = vld [vmem:[#allocation21_spill] sm:$0xff] }
  0xc9   : > { %v928_v39 = vmul.f32 %v2985_v53, %v336_v57  ;;  %v929_v31 = vmul.f32 %v2986_v19, %v337_v54  ;;  %v338_v1 = vld [vmem:[%s1757_s29 + $0x500] sm:$0xff]  ;;  %v339_v30 = vld [vmem:[%s1757_s29 + $0x508] sm:$0xff]  ;;  %v340_v56 = vld [vmem:[%s1757_s29 + $0x510] sm:$0xff]  ;;  %1178 = vst [vmem:[%s1830_s20 + $0x4c0] sm:$0xff] %v922_v37 }
  0xca   : > { %1179 = vst [vmem:[%s1830_s20 + $0x4c8] sm:$0xff] %v923_v36  ;;  %1180 = vst [vmem:[%s1830_s20 + $0x4d0] sm:$0xff] %v924_v7  ;;  %v930_v46 = vmul.f32 %v2950_v0, %v338_v1  ;;  %v2987_v60 = vld [vmem:[#allocation23_spill] sm:$0xff]  ;;  %v2988_v32 = vld [vmem:[#allocation24_spill] sm:$0xff] }
  0xcb   : > { %1181 = vst [vmem:[%s1830_s20 + $0x4d8] sm:$0xff] %v925_v17  ;;  %v931_v27 = vmul.f32 %v2987_v60, %v339_v30  ;;  %v932_v57 = vmul.f32 %v2988_v32, %v340_v56  ;;  %v341_v54 = vld [vmem:[%s1757_s29 + $0x518] sm:$0xff]  ;;  %v342_v19 = vld [vmem:[%s1757_s29 + $0x520] sm:$0xff]  ;;  %v343_v53 = vld [vmem:[%s1757_s29 + $0x528] sm:$0xff] }
  0xcc   : > { %1182 = vst [vmem:[%s1830_s20 + $0x4e0] sm:$0xff] %v926_v52  ;;  %1183 = vst [vmem:[%s1830_s20 + $0x4e8] sm:$0xff] %v927_v55  ;;  %v2989_v37 = vld [vmem:[#allocation25_spill] sm:$0xff]  ;;  %v934_v7 = vmul.f32 %v2954_v28, %v342_v19  ;;  %v2990_v1 = vld [vmem:[#allocation27_spill] sm:$0xff] }
  0xcd   : > { %1184 = vst [vmem:[%s1830_s20 + $0x4f0] sm:$0xff] %v928_v39  ;;  %1185 = vst [vmem:[%s1830_s20 + $0x4f8] sm:$0xff] %v929_v31  ;;  %v933_v36 = vmul.f32 %v2989_v37, %v341_v54  ;;  %v935_v17 = vmul.f32 %v2990_v1, %v343_v53  ;;  %v344_v30 = vld [vmem:[%s1757_s29 + $0x530] sm:$0xff]  ;;  %v345_v56 = vld [vmem:[%s1757_s29 + $0x538] sm:$0xff] }
  0xce   : > { %v346_v32 = vld [vmem:[%s1757_s29 + $0x540] sm:$0xff]  ;;  %1186 = vst [vmem:[%s1830_s20 + $0x500] sm:$0xff] %v930_v46  ;;  %1187 = vst [vmem:[%s1830_s20 + $0x508] sm:$0xff] %v931_v27  ;;  %v2991_v52 = vld [vmem:[#allocation28_spill] sm:$0xff] }
  0xcf   : > { %1188 = vst [vmem:[%s1830_s20 + $0x510] sm:$0xff] %v932_v57  ;;  %v936_v55 = vmul.f32 %v2991_v52, %v344_v30  ;;  %v2992_v39 = vld [vmem:[#allocation29_spill] sm:$0xff]  ;;  %v938_v19 = vmul.f32 %v2958_v63, %v346_v32  ;;  %v347_v54 = vld [vmem:[%s1757_s29 + $0x548] sm:$0xff]  ;;  %v349_v1 = vld [vmem:[%s1757_s29 + $0x558] sm:$0xff] }
  0xd0   : > { %v937_v31 = vmul.f32 %v2992_v39, %v345_v56  ;;  %v348_v53 = vld [vmem:[%s1757_s29 + $0x550] sm:$0xff]  ;;  %1189 = vst [vmem:[%s1830_s20 + $0x518] sm:$0xff] %v933_v36  ;;  %1190 = vst [vmem:[%s1830_s20 + $0x520] sm:$0xff] %v934_v7  ;;  %v2993_v46 = vld [vmem:[#allocation31_spill] sm:$0xff] }
  0xd1   : > { %1191 = vst [vmem:[%s1830_s20 + $0x528] sm:$0xff] %v935_v17  ;;  %v939_v27 = vmul.f32 %v2993_v46, %v347_v54  ;;  %v2994_v57 = vld [vmem:[#allocation32_spill] sm:$0xff]  ;;  %v2995_v52 = vld [vmem:[#allocation33_spill] sm:$0xff]  ;;  %v350_v39 = vld [vmem:[%s1757_s29 + $0x560] sm:$0xff] }
  0xd2   : > { %v940_v30 = vmul.f32 %v2994_v57, %v348_v53  ;;  %v941_v56 = vmul.f32 %v2995_v52, %v349_v1  ;;  %v351_v32 = vld [vmem:[%s1757_s29 + $0x568] sm:$0xff]  ;;  %v352_v63 = vld [vmem:[%s1757_s29 + $0x570] sm:$0xff]  ;;  %1192 = vst [vmem:[%s1830_s20 + $0x530] sm:$0xff] %v936_v55  ;;  %1193 = vst [vmem:[%s1830_s20 + $0x538] sm:$0xff] %v937_v31  ;;  %v942_v36 = vmul.f32 %v2962_v45, %v350_v39 }
  0xd3   : > { %1194 = vst [vmem:[%s1830_s20 + $0x540] sm:$0xff] %v938_v19  ;;  %v943_v7 = vmul.f32 %v2963_v61, %v351_v32  ;;  %v2996_v17 = vld [vmem:[#allocation36_spill] sm:$0xff]  ;;  %v353_v53 = vld [vmem:[%s1757_s29 + $0x578] sm:$0xff]  ;;  %v354_v1 = vld [vmem:[%s1757_s29 + $0x580] sm:$0xff] }
  0xd4   : > { %v944_v54 = vmul.f32 %v2996_v17, %v352_v63  ;;  %v355_v52 = vld [vmem:[%s1757_s29 + $0x588] sm:$0xff]  ;;  %1195 = vst [vmem:[%s1830_s20 + $0x548] sm:$0xff] %v939_v27  ;;  %1196 = vst [vmem:[%s1830_s20 + $0x550] sm:$0xff] %v940_v30  ;;  %v2997_v55 = vld [vmem:[#allocation37_spill] sm:$0xff]  ;;  %v946_v39 = vmul.f32 %v2078_v34, %v354_v1 }
  0xd5   : > { %1197 = vst [vmem:[%s1830_s20 + $0x558] sm:$0xff] %v941_v56  ;;  %v945_v31 = vmul.f32 %v2997_v55, %v353_v53  ;;  %v2998_v19 = vld [vmem:[#allocation39_spill] sm:$0xff]  ;;  %v356_v61 = vld [vmem:[%s1757_s29 + $0x590] sm:$0xff]  ;;  %v357_v63 = vld [vmem:[%s1757_s29 + $0x598] sm:$0xff] }
  0xd6   : > { %v947_v32 = vmul.f32 %v2998_v19, %v355_v52  ;;  %v358_v17 = vld [vmem:[%s1757_s29 + $0x5a0] sm:$0xff]  ;;  %1198 = vst [vmem:[%s1830_s20 + $0x560] sm:$0xff] %v942_v36  ;;  %1199 = vst [vmem:[%s1830_s20 + $0x568] sm:$0xff] %v943_v7  ;;  %v2999_v27 = vld [vmem:[#allocation40_spill] sm:$0xff] }
  0xd7   : > { %1200 = vst [vmem:[%s1830_s20 + $0x570] sm:$0xff] %v944_v54  ;;  %v948_v30 = vmul.f32 %v2999_v27, %v356_v61  ;;  %v3000_v56 = vld [vmem:[#allocation41_spill] sm:$0xff]  ;;  %v950_v1 = vmul.f32 %v2969_v5, %v358_v17  ;;  %v359_v34 = vld [vmem:[%s1757_s29 + $0x5a8] sm:$0xff]  ;;  %v361_v19 = vld [vmem:[%s1757_s29 + $0x5b8] sm:$0xff] }
  0xd8   : > { %v949_v53 = vmul.f32 %v3000_v56, %v357_v63  ;;  %v360_v52 = vld [vmem:[%s1757_s29 + $0x5b0] sm:$0xff]  ;;  %1201 = vst [vmem:[%s1830_s20 + $0x578] sm:$0xff] %v945_v31  ;;  %1202 = vst [vmem:[%s1830_s20 + $0x580] sm:$0xff] %v946_v39  ;;  %v951_v36 = vmul.f32 %v2970_v47, %v359_v34  ;;  %v362_v63 = vld [vmem:[%s1757_s29 + $0x5c0] sm:$0xff] }
  0xd9   : > { %1203 = vst [vmem:[%s1830_s20 + $0x588] sm:$0xff] %v947_v32  ;;  %v952_v61 = vmul.f32 %v2971_v59, %v360_v52  ;;  %v3001_v7 = vld [vmem:[#allocation45_spill] sm:$0xff]  ;;  %v363_v17 = vld [vmem:[%s1757_s29 + $0x5c8] sm:$0xff]  ;;  %1204 = vst [vmem:[%s1830_s20 + $0x590] sm:$0xff] %v948_v30  ;;  %v954_v31 = vmul.f32 %v2132_v21, %v362_v63 }
  0xda   : > { %v953_v54 = vmul.f32 %v3001_v7, %v361_v19  ;;  %v364_v5 = vld [vmem:[%s1757_s29 + $0x5d0] sm:$0xff]  ;;  %1205 = vst [vmem:[%s1830_s20 + $0x598] sm:$0xff] %v949_v53  ;;  %1206 = vst [vmem:[%s1830_s20 + $0x5a0] sm:$0xff] %v950_v1  ;;  %v955_v34 = vmul.f32 %v2135_v33, %v363_v17  ;;  %v365_v32 = vld [vmem:[%s1757_s29 + $0x5d8] sm:$0xff] }
  0xdb   : > { %v956_v39 = vmul.f32 %v2973_v35, %v364_v5  ;;  %v366_v19 = vld [vmem:[%s1757_s29 + $0x5e0] sm:$0xff]  ;;  %v367_v52 = vld [vmem:[%s1757_s29 + $0x5e8] sm:$0xff]  ;;  %1207 = vst [vmem:[%s1830_s20 + $0x5a8] sm:$0xff] %v951_v36  ;;  %1208 = vst [vmem:[%s1830_s20 + $0x5b0] sm:$0xff] %v952_v61 }
  0xdc   : > { %1209 = vst [vmem:[%s1830_s20 + $0x5b8] sm:$0xff] %v953_v54  ;;  %v3002_v30 = vld [vmem:[#allocation47_spill] sm:$0xff]  ;;  %v958_v1 = vmul.f32 %v2152_v2, %v366_v19  ;;  %v959_v63 = vmul.f32 %v2155_v3, %v367_v52  ;;  %v368_v17 = vld [vmem:[%s1757_s29 + $0x5f0] sm:$0xff]  ;;  %v369_v5 = vld [vmem:[%s1757_s29 + $0x5f8] sm:$0xff] }
  0xdd   : > { %v957_v53 = vmul.f32 %v3002_v30, %v365_v32  ;;  %v370_v35 = vld [vmem:[%s1757_s29 + $0x600] sm:$0xff]  ;;  %1210 = vst [vmem:[%s1830_s20 + $0x5c0] sm:$0xff] %v954_v31  ;;  %1211 = vst [vmem:[%s1830_s20 + $0x5c8] sm:$0xff] %v955_v34  ;;  %v960_v36 = vmul.f32 %v2975_v40, %v368_v17  ;;  %v961_v61 = vmul.f32 %v2976_v62, %v369_v5  ;;  %v371_v32 = vld [vmem:[%s1757_s29 + $0x608] sm:$0xff] }
  0xde   : > { %1212 = vst [vmem:[%s1830_s20 + $0x5d0] sm:$0xff] %v956_v39  ;;  %v962_v54 = vmul.f32 %v1786_v13, %v370_v35  ;;  %v372_v19 = vld [vmem:[%s1757_s29 + $0x610] sm:$0xff]  ;;  %v373_v52 = vld [vmem:[%s1757_s29 + $0x618] sm:$0xff]  ;;  %1214 = vst [vmem:[%s1830_s20 + $0x5e0] sm:$0xff] %v958_v1  ;;  %v963_v31 = vmul.f32 %v1789_v14, %v371_v32 }
  0xdf   : > { %1213 = vst [vmem:[%s1830_s20 + $0x5d8] sm:$0xff] %v957_v53  ;;  %1215 = vst [vmem:[%s1830_s20 + $0x5e8] sm:$0xff] %v959_v63  ;;  %v964_v34 = vmul.f32 %v1793_v16, %v372_v19  ;;  %v965_v39 = vmul.f32 %v1797_v18, %v373_v52  ;;  %v374_v17 = vld [vmem:[%s1757_s29 + $0x620] sm:$0xff]  ;;  %v375_v13 = vld [vmem:[%s1757_s29 + $0x628] sm:$0xff] }
  0xe0   : > { %v376_v35 = vld [vmem:[%s1757_s29 + $0x630] sm:$0xff]  ;;  %1216 = vst [vmem:[%s1830_s20 + $0x5f0] sm:$0xff] %v960_v36  ;;  %1217 = vst [vmem:[%s1830_s20 + $0x5f8] sm:$0xff] %v961_v61  ;;  %v966_v53 = vmul.f32 %v1801_v20, %v374_v17  ;;  %v967_v14 = vmul.f32 %v1805_v22, %v375_v13  ;;  %v377_v1 = vld [vmem:[%s1757_s29 + $0x638] sm:$0xff] }
  0xe1   : > { %1218 = vst [vmem:[%s1830_s20 + $0x600] sm:$0xff] %v962_v54  ;;  %v968_v16 = vmul.f32 %v1809_v24, %v376_v35  ;;  %v378_v18 = vld [vmem:[%s1757_s29 + $0x640] sm:$0xff]  ;;  %v379_v63 = vld [vmem:[%s1757_s29 + $0x648] sm:$0xff]  ;;  %1219 = vst [vmem:[%s1830_s20 + $0x608] sm:$0xff] %v963_v31  ;;  %v969_v5 = vmul.f32 %v1813_v26, %v377_v1 }
  0xe2   : > { %1220 = vst [vmem:[%s1830_s20 + $0x610] sm:$0xff] %v964_v34  ;;  %1221 = vst [vmem:[%s1830_s20 + $0x618] sm:$0xff] %v965_v39  ;;  %v970_v20 = vmul.f32 %v1837_v41, %v378_v18  ;;  %v971_v22 = vmul.f32 %v1840_v42, %v379_v63  ;;  %v380_v36 = vld [vmem:[%s1757_s29 + $0x650] sm:$0xff]  ;;  %v381_v24 = vld [vmem:[%s1757_s29 + $0x658] sm:$0xff] }
  0xe3   : > { %v382_v61 = vld [vmem:[%s1757_s29 + $0x660] sm:$0xff]  ;;  %1222 = vst [vmem:[%s1830_s20 + $0x620] sm:$0xff] %v966_v53  ;;  %1223 = vst [vmem:[%s1830_s20 + $0x628] sm:$0xff] %v967_v14  ;;  %v972_v54 = vmul.f32 %v1843_v43, %v380_v36  ;;  %v973_v26 = vmul.f32 %v1846_v44, %v381_v24  ;;  %v383_v32 = vld [vmem:[%s1757_s29 + $0x668] sm:$0xff] }
  0xe4   : > { %1224 = vst [vmem:[%s1830_s20 + $0x630] sm:$0xff] %v968_v16  ;;  %v974_v41 = vmul.f32 %v1856_v48, %v382_v61  ;;  %v384_v42 = vld [vmem:[%s1757_s29 + $0x670] sm:$0xff]  ;;  %v385_v19 = vld [vmem:[%s1757_s29 + $0x678] sm:$0xff]  ;;  %1225 = vst [vmem:[%s1830_s20 + $0x638] sm:$0xff] %v969_v5  ;;  %v975_v52 = vmul.f32 %v1859_v49, %v383_v32 }
  0xe5   : > { %1226 = vst [vmem:[%s1830_s20 + $0x640] sm:$0xff] %v970_v20  ;;  %1227 = vst [vmem:[%s1830_s20 + $0x648] sm:$0xff] %v971_v22  ;;  %v976_v43 = vmul.f32 %v1862_v50, %v384_v42  ;;  %v977_v44 = vmul.f32 %v1865_v51, %v385_v19  ;;  %v386_v31 = vld [vmem:[%s1757_s29 + $0x680] sm:$0xff]  ;;  %v387_v48 = vld [vmem:[%s1757_s29 + $0x688] sm:$0xff] }
  0xe6   : > { %v388_v34 = vld [vmem:[%s1757_s29 + $0x690] sm:$0xff]  ;;  %1228 = vst [vmem:[%s1830_s20 + $0x650] sm:$0xff] %v972_v54  ;;  %1229 = vst [vmem:[%s1830_s20 + $0x658] sm:$0xff] %v973_v26  ;;  %v978_v39 = vmul.f32 %v1885_v10, %v386_v31  ;;  %v979_v49 = vmul.f32 %v1888_v11, %v387_v48  ;;  %v389_v17 = vld [vmem:[%s1757_s29 + $0x698] sm:$0xff] }
  0xe7   : > { %1230 = vst [vmem:[%s1830_s20 + $0x660] sm:$0xff] %v974_v41  ;;  %v980_v50 = vmul.f32 %v1891_v12, %v388_v34  ;;  %v390_v51 = vld [vmem:[%s1757_s29 + $0x6a0] sm:$0xff]  ;;  %v391_v13 = vld [vmem:[%s1757_s29 + $0x6a8] sm:$0xff]  ;;  %1231 = vst [vmem:[%s1830_s20 + $0x668] sm:$0xff] %v975_v52  ;;  %v981_v35 = vmul.f32 %v1894_v15, %v389_v17 }
  0xe8   : > { %1232 = vst [vmem:[%s1830_s20 + $0x670] sm:$0xff] %v976_v43  ;;  %1233 = vst [vmem:[%s1830_s20 + $0x678] sm:$0xff] %v977_v44  ;;  %v982_v10 = vmul.f32 %v1904_v23, %v390_v51  ;;  %v983_v11 = vmul.f32 %v2977_v25, %v391_v13  ;;  %v392_v53 = vld [vmem:[%s1757_s29 + $0x6b0] sm:$0xff]  ;;  %v393_v12 = vld [vmem:[%s1757_s29 + $0x6b8] sm:$0xff] }
  0xe9   : > { %v394_v14 = vld [vmem:[%s1757_s29 + $0x6c0] sm:$0xff]  ;;  %1234 = vst [vmem:[%s1830_s20 + $0x680] sm:$0xff] %v978_v39  ;;  %1235 = vst [vmem:[%s1830_s20 + $0x688] sm:$0xff] %v979_v49  ;;  %v984_v16 = vmul.f32 %v2978_v4, %v392_v53  ;;  %v985_v15 = vmul.f32 %v2979_v38, %v393_v12  ;;  %v395_v1 = vld [vmem:[%s1757_s29 + $0x6c8] sm:$0xff] }
  0xea   : > { %1236 = vst [vmem:[%s1830_s20 + $0x690] sm:$0xff] %v980_v50  ;;  %v986_v23 = vmul.f32 %v2980_v9, %v394_v14  ;;  %v396_v25 = vld [vmem:[%s1757_s29 + $0x6d0] sm:$0xff]  ;;  %v397_v18 = vld [vmem:[%s1757_s29 + $0x6d8] sm:$0xff]  ;;  %1237 = vst [vmem:[%s1830_s20 + $0x698] sm:$0xff] %v981_v35  ;;  %v987_v63 = vmul.f32 %v2981_v58, %v395_v1 }
  0xeb   : > { %1238 = vst [vmem:[%s1830_s20 + $0x6a0] sm:$0xff] %v982_v10  ;;  %1239 = vst [vmem:[%s1830_s20 + $0x6a8] sm:$0xff] %v983_v11  ;;  %v988_v4 = vmul.f32 %v2982_v6, %v396_v25  ;;  %v3003_v5 = vld [vmem:[#allocation17_spill] sm:$0xff]  ;;  %v398_v20 = vld [vmem:[%s1757_s29 + $0x6e0] sm:$0xff] }
  0xec   : > { %v989_v38 = vmul.f32 %v3003_v5, %v397_v18  ;;  %v399_v9 = vld [vmem:[%s1757_s29 + $0x6e8] sm:$0xff]  ;;  %v400_v22 = vld [vmem:[%s1757_s29 + $0x6f0] sm:$0xff]  ;;  %1240 = vst [vmem:[%s1830_s20 + $0x6b0] sm:$0xff] %v984_v16  ;;  %1241 = vst [vmem:[%s1830_s20 + $0x6b8] sm:$0xff] %v985_v15  ;;  %v990_v36 = vmul.f32 %v2946_v8, %v398_v20 }
  0xed   : > { %1242 = vst [vmem:[%s1830_s20 + $0x6c0] sm:$0xff] %v986_v23  ;;  %v991_v58 = vmul.f32 %v2984_v29, %v399_v9  ;;  %v3004_v24 = vld [vmem:[#allocation20_spill] sm:$0xff]  ;;  %v401_v61 = vld [vmem:[%s1757_s29 + $0x6f8] sm:$0xff]  ;;  %v402_v54 = vld [vmem:[%s1757_s29 + $0x700] sm:$0xff] }
  0xee   : > { %v992_v6 = vmul.f32 %v3004_v24, %v400_v22  ;;  %v403_v26 = vld [vmem:[%s1757_s29 + $0x708] sm:$0xff]  ;;  %1243 = vst [vmem:[%s1830_s20 + $0x6c8] sm:$0xff] %v987_v63  ;;  %1244 = vst [vmem:[%s1830_s20 + $0x6d0] sm:$0xff] %v988_v4  ;;  %v3005_v41 = vld [vmem:[#allocation21_spill] sm:$0xff]  ;;  %v994_v8 = vmul.f32 %v2950_v0, %v402_v54 }
  0xef   : > { %1245 = vst [vmem:[%s1830_s20 + $0x6d8] sm:$0xff] %v989_v38  ;;  %v993_v32 = vmul.f32 %v3005_v41, %v401_v61  ;;  %v995_v29 = vmul.f32 %v2987_v60, %v403_v26  ;;  %v404_v42 = vld [vmem:[%s1757_s29 + $0x710] sm:$0xff]  ;;  %v405_v19 = vld [vmem:[%s1757_s29 + $0x718] sm:$0xff]  ;;  %v406_v52 = vld [vmem:[%s1757_s29 + $0x720] sm:$0xff] }
  0xf0   : > { %1246 = vst [vmem:[%s1830_s20 + $0x6e0] sm:$0xff] %v990_v36  ;;  %1247 = vst [vmem:[%s1830_s20 + $0x6e8] sm:$0xff] %v991_v58  ;;  %v3006_v43 = vld [vmem:[#allocation24_spill] sm:$0xff]  ;;  %v997_v31 = vmul.f32 %v2989_v37, %v405_v19  ;;  %v998_v0 = vmul.f32 %v2954_v28, %v406_v52  ;;  %v408_v60 = vld [vmem:[%s1757_s29 + $0x730] sm:$0xff] }
  0xf1   : > { %1248 = vst [vmem:[%s1830_s20 + $0x6f0] sm:$0xff] %v992_v6  ;;  %v996_v44 = vmul.f32 %v3006_v43, %v404_v42  ;;  %v407_v48 = vld [vmem:[%s1757_s29 + $0x728] sm:$0xff]  ;;  %v409_v34 = vld [vmem:[%s1757_s29 + $0x738] sm:$0xff]  ;;  %1249 = vst [vmem:[%s1830_s20 + $0x6f8] sm:$0xff] %v993_v32 }
  0xf2   : > { %1250 = vst [vmem:[%s1830_s20 + $0x700] sm:$0xff] %v994_v8  ;;  %1251 = vst [vmem:[%s1830_s20 + $0x708] sm:$0xff] %v995_v29  ;;  %v3007_v39 = vld [vmem:[#allocation27_spill] sm:$0xff]  ;;  %v3008_v50 = vld [vmem:[#allocation28_spill] sm:$0xff] }
  0xf3   : > { %v999_v49 = vmul.f32 %v3007_v39, %v407_v48  ;;  %v1000_v17 = vmul.f32 %v3008_v50, %v408_v60  ;;  %v3009_v51 = vld [vmem:[#allocation29_spill] sm:$0xff]  ;;  %v410_v13 = vld [vmem:[%s1757_s29 + $0x740] sm:$0xff]  ;;  %v411_v28 = vld [vmem:[%s1757_s29 + $0x748] sm:$0xff]  ;;  %1252 = vst [vmem:[%s1830_s20 + $0x710] sm:$0xff] %v996_v44 }
  0xf4   : > { %v1001_v37 = vmul.f32 %v3009_v51, %v409_v34  ;;  %v412_v35 = vld [vmem:[%s1757_s29 + $0x750] sm:$0xff]  ;;  %1253 = vst [vmem:[%s1830_s20 + $0x718] sm:$0xff] %v997_v31  ;;  %1254 = vst [vmem:[%s1830_s20 + $0x720] sm:$0xff] %v998_v0  ;;  %v3010_v10 = vld [vmem:[#allocation30_spill] sm:$0xff]  ;;  %v1003_v53 = vmul.f32 %v2993_v46, %v411_v28 }
  0xf5   : > { %v1002_v11 = vmul.f32 %v3010_v10, %v410_v13  ;;  %v1004_v12 = vmul.f32 %v2994_v57, %v412_v35  ;;  %v413_v14 = vld [vmem:[%s1757_s29 + $0x758] sm:$0xff]  ;;  %v414_v16 = vld [vmem:[%s1757_s29 + $0x760] sm:$0xff]  ;;  %v415_v15 = vld [vmem:[%s1757_s29 + $0x768] sm:$0xff]  ;;  %1255 = vst [vmem:[%s1830_s20 + $0x728] sm:$0xff] %v999_v49 }
  0xf6   : > { %1256 = vst [vmem:[%s1830_s20 + $0x730] sm:$0xff] %v1000_v17  ;;  %1257 = vst [vmem:[%s1830_s20 + $0x738] sm:$0xff] %v1001_v37  ;;  %v3011_v23 = vld [vmem:[#allocation33_spill] sm:$0xff]  ;;  %v1006_v25 = vmul.f32 %v2962_v45, %v414_v16  ;;  %v3012_v18 = vld [vmem:[#allocation35_spill] sm:$0xff] }
  0xf7   : > { %v1005_v1 = vmul.f32 %v3011_v23, %v413_v14  ;;  %v1007_v46 = vmul.f32 %v3012_v18, %v415_v15  ;;  %v416_v63 = vld [vmem:[%s1757_s29 + $0x770] sm:$0xff]  ;;  %v417_v57 = vld [vmem:[%s1757_s29 + $0x778] sm:$0xff]  ;;  %v418_v4 = vld [vmem:[%s1757_s29 + $0x780] sm:$0xff]  ;;  %1258 = vst [vmem:[%s1830_s20 + $0x740] sm:$0xff] %v1002_v11 }
  0xf8   : > { %1259 = vst [vmem:[%s1830_s20 + $0x748] sm:$0xff] %v1003_v53  ;;  %1260 = vst [vmem:[%s1830_s20 + $0x750] sm:$0xff] %v1004_v12  ;;  %v3013_v5 = vld [vmem:[#allocation36_spill] sm:$0xff]  ;;  %v1009_v20 = vmul.f32 %v2997_v55, %v417_v57  ;;  %v3014_v9 = vld [vmem:[#allocation38_spill] sm:$0xff] }
  0xf9   : > { %v1008_v38 = vmul.f32 %v3013_v5, %v416_v63  ;;  %v1010_v45 = vmul.f32 %v3014_v9, %v418_v4  ;;  %v419_v22 = vld [vmem:[%s1757_s29 + $0x788] sm:$0xff]  ;;  %v420_v36 = vld [vmem:[%s1757_s29 + $0x790] sm:$0xff]  ;;  %v421_v58 = vld [vmem:[%s1757_s29 + $0x798] sm:$0xff]  ;;  %1261 = vst [vmem:[%s1830_s20 + $0x758] sm:$0xff] %v1005_v1 }
  0xfa   : > { %1262 = vst [vmem:[%s1830_s20 + $0x760] sm:$0xff] %v1006_v25  ;;  %1263 = vst [vmem:[%s1830_s20 + $0x768] sm:$0xff] %v1007_v46  ;;  %v3015_v24 = vld [vmem:[#allocation39_spill] sm:$0xff]  ;;  %v1012_v61 = vmul.f32 %v2999_v27, %v420_v36  ;;  %v1013_v55 = vmul.f32 %v3000_v56, %v421_v58  ;;  %v423_v26 = vld [vmem:[%s1757_s29 + $0x7a8] sm:$0xff] }
  0xfb   : > { %v1011_v6 = vmul.f32 %v3015_v24, %v419_v22  ;;  %v422_v54 = vld [vmem:[%s1757_s29 + $0x7a0] sm:$0xff]  ;;  %v424_v41 = vld [vmem:[%s1757_s29 + $0x7b0] sm:$0xff]  ;;  %1264 = vst [vmem:[%s1830_s20 + $0x770] sm:$0xff] %v1008_v38  ;;  %1265 = vst [vmem:[%s1830_s20 + $0x778] sm:$0xff] %v1009_v20  ;;  %v1015_v27 = vmul.f32 %v2970_v47, %v423_v26 }
  0xfc   : > { %1266 = vst [vmem:[%s1830_s20 + $0x780] sm:$0xff] %v1010_v45  ;;  %v3016_v32 = vld [vmem:[#allocation42_spill] sm:$0xff]  ;;  %v1016_v56 = vmul.f32 %v2971_v59, %v424_v41  ;;  %v426_v42 = vld [vmem:[%s1757_s29 + $0x7c0] sm:$0xff]  ;;  %v427_v19 = vld [vmem:[%s1757_s29 + $0x7c8] sm:$0xff] }
  0xfd   : > { %v1014_v8 = vmul.f32 %v3016_v32, %v422_v54  ;;  %v425_v29 = vld [vmem:[%s1757_s29 + $0x7b8] sm:$0xff]  ;;  %1267 = vst [vmem:[%s1830_s20 + $0x788] sm:$0xff] %v1011_v6  ;;  %1268 = vst [vmem:[%s1830_s20 + $0x790] sm:$0xff] %v1012_v61  ;;  %v1018_v43 = vmul.f32 %v2132_v21, %v426_v42  ;;  %v1019_v47 = vmul.f32 %v2135_v33, %v427_v19  ;;  %v428_v59 = vld [vmem:[%s1757_s29 + $0x7d0] sm:$0xff] }
  0xfe   : > { %1269 = vst [vmem:[%s1830_s20 + $0x798] sm:$0xff] %v1013_v55  ;;  %v1017_v52 = vmul.f32 %v3001_v7, %v425_v29  ;;  %v429_v44 = vld [vmem:[%s1757_s29 + $0x7d8] sm:$0xff]  ;;  %v430_v31 = vld [vmem:[%s1757_s29 + $0x7e0] sm:$0xff]  ;;  %1271 = vst [vmem:[%s1830_s20 + $0x7a8] sm:$0xff] %v1015_v27 }
  0xff   : > { %1270 = vst [vmem:[%s1830_s20 + $0x7a0] sm:$0xff] %v1014_v8  ;;  %1272 = vst [vmem:[%s1830_s20 + $0x7b0] sm:$0xff] %v1016_v56  ;;  %v3017_v0 = vld [vmem:[#allocation46_spill] sm:$0xff]  ;;  %v1021_v7 = vmul.f32 %v3002_v30, %v429_v44  ;;  %v1022_v21 = vmul.f32 %v2152_v2, %v430_v31  ;;  %v431_v33 = vld [vmem:[%s1757_s29 + $0x7e8] sm:$0xff] }
 0x100   : > { %v1020_v48 = vmul.f32 %v3017_v0, %v428_v59  ;;  %v432_v60 = vld [vmem:[%s1757_s29 + $0x7f0] sm:$0xff]  ;;  %v433_v34 = vld [vmem:[%s1757_s29 + $0x7f8] sm:$0xff]  ;;  %1273 = vst [vmem:[%s1830_s20 + $0x7b8] sm:$0xff] %v1017_v52  ;;  %1274 = vst [vmem:[%s1830_s20 + $0x7c0] sm:$0xff] %v1018_v43  ;;  %v1023_v2 = vmul.f32 %v2155_v3, %v431_v33 }
 0x101   : > { %1275 = vst [vmem:[%s1830_s20 + $0x7c8] sm:$0xff] %v1019_v47  ;;  %v1024_v30 = vmul.f32 %v2975_v40, %v432_v60  ;;  %v1025_v39 = vmul.f32 %v2976_v62, %v433_v34  ;;  %1277 = vst [vmem:[%s1830_s20 + $0x7d8] sm:$0xff] %v1021_v7 }
 0x102   : > { %1276 = vst [vmem:[%s1830_s20 + $0x7d0] sm:$0xff] %v1020_v48  ;;  %1278 = vst [vmem:[%s1830_s20 + $0x7e0] sm:$0xff] %v1022_v21 }
 0x103   : > { %1279 = vst [vmem:[%s1830_s20 + $0x7e8] sm:$0xff] %v1023_v2  ;;  %1280 = vst [vmem:[%s1830_s20 + $0x7f0] sm:$0xff] %v1024_v30 }
 0x104   : > { %1281 = vst [vmem:[%s1830_s20 + $0x7f8] sm:$0xff] %v1025_v39 }
 0x105   : > { %1534 = shalt.err (!%p1531_p13)
}
 0x106   : > { %s1535_s16 = scalar_lea.hbm %s2742_s26, 32768  ;;  %s1539_s24 = scalar_lea.hbm %s2804_s2, 65536 }
 0x107   : > { %p1536_p7 = scmp.ne.s32.totalorder %s2742_s26, %s1535_s16  ;;  %p1540_p1 = scmp.lt.u32.totalorder %s2742_s26, %s2804_s2 }
 0x108   : > { %p1541_p11 = scmp.lt.u32.totalorder %s1539_s24, %s1535_s16  ;;  %p1543_p9 = scmp.lt.u32.totalorder %s1535_s16, %s2742_s26 }
 0x109   : > { %p1537_p3 = pnand %p1536_p7, %p3018_p10 }
 0x10a   : > { %p1542_p8 = por %p1541_p11, %p1540_p1 }
 0x10b   : > { %p1538_p12 = pneg %p1537_p3 }
 0x10c   : > { %p1544_p2 = por %p1543_p9, %p1542_p8 }
 0x10e   : > { %p1545_p4 = pnand %p1544_p2, %p1538_p12 }
 0x110   : > { %1548 = shalt.err (!%p1545_p4)
}
 0x111   : > { %s1598_s25 = smov 8192   ;;  %s1599_s29 = smov 512  }
 0x112   : > { %1408 = dma.vmem_to_hbm [thread:$0]  (%p3018_p10), %s2746_s28, 32768, %s2742_s26, %s1283_s13, %s1598_s25, %s1598_s25, %s1599_s29  }
 0x113 PF: > { %s1312_s20 = sand.u32 1, %s1579_s9   ;;  %p3019_p5 = scmp.ne.s32.totalorder %s2894_s22, 0 }
 0x114   : > { %p3020_p0 = scmp.ge.s32.totalorder %s1591_s12, 2  ;;  %s1313_s23 = scalar_lea.sflag [#allocation4], %s1312_s20 }
 0x116   : > { %p1419_p6 = pnand %p3020_p0, %p3019_p5 }
 0x118   : > { %1574 = dma.done.wait (!%p1419_p6), %s1313_s23, 32768  }
 0x119   : > { %1576 = vsyncadd (!%p1419_p6), %s1313_s23, 4294934528  ;;  %p16_p13 = scmp.ge.s32.totalorder %s1640_s15, 4   ;;  %s3021_s9 = smov %s1583_s10 }
 0x11a   : > { %s3022_s10 = smov %s1587_s11  ;;  %s3023_s11 = smov %s1652_s18 }
 0x11b   : > { %s3024_s12 = smov %s1640_s15  ;;  %18 = sbr.rel (!%p16_p13) target bundleno = 6 (0x6), region = 77 }
 0x122   :  { %1318 = vsyncpa [#allocation3], 1 }
 0x123   :  { %1320 = vsyncpa [#allocation3 + $0x1], 1 }
 0x124   :  { %1321 = vsyncpa [#allocation6], 1 }
 0x125   :  { %1322 = vsyncpa [#allocation4], 1 }
 0x126   :  { %1324 = vsyncpa [#allocation4 + $0x1], 1 }

</bundles_post_ra>
